<compile_context>
chip_gen: v6e
topology: v6e:2x2x1
jax: 0.10.0
libtpu: 0.0.40
codegen_flags: <defaults>
</compile_context>

<pallas_src>
import jax
import jax.numpy as jnp
from jax.experimental import pallas as pl
from jax.experimental.pallas import tpu as pltpu


def _pick_time_tile(T, cap):
    """Largest tile tt <= cap with T % tt == 0 and tt a multiple of 8 (or tt == T).

    tt also sets the unroll length of the serial loop; for production-size H/B
    it should be swept (e.g. 8/16/32) to trade grid overhead vs vreg pressure.
    """
    for tt in range(min(T, cap), 0, -1):
        if T % tt == 0 and (tt % 8 == 0 or tt == T):
            return tt
    return T


def _vmem_limit_bytes():
    """Per-generation scoped-VMEM budget: ~3/4 of capacity (96 MiB v5e/v6e, 48 MiB v7x)."""
    try:
        cap = int(pltpu.get_tpu_info().vmem_capacity_bytes)
        return max(32 * 1024 * 1024, (cap * 3) // 4)
    except Exception:
        return 64 * 1024 * 1024


# ----------------------------------------------------------------------------
# Fused BiLSTM kernel.
#
# Gate/state layout (interleaved so every gate segment spans both directions):
#   state  h = [h_fwd | h_bwd]                                    -> [B, 2H]
#   gates    = [i_f i_b | f_f f_b | g_f g_b | o_f o_b] (each H)   -> [B, 8H]
#   W_hh_comb[2H, 8H] is block-diagonal in this layout, so
#   [h_fwd | h_bwd] @ W_hh_comb produces both directions' recurrent gates in
#   one 256-wide MXU pass.
# ----------------------------------------------------------------------------
def _bilstm_fused_kernel(xf_ref, xb_ref, mf_ref, mb_ref, wih_ref, bg_ref,
                         whh_ref, wlin_ref, emf_ref, emb_ref,
                         gf_scr, gb_scr, hf_scr, hb_scr, h_c, c_c):
    tb = pl.program_id(0)
    ts, B, E = xf_ref.shape
    H2 = h_c.shape[-1]          # 2H (both directions)
    H = H2 // 2
    O = emf_ref.shape[-1]

    @pl.when(tb == 0)
    def _():
        h_c[...] = jnp.zeros_like(h_c)
        c_c[...] = jnp.zeros_like(c_c)

    # ---- block preamble: input projection for this time-block (off the serial
    #      path). Bias is folded in once (into the forward-block projection).
    xf2 = xf_ref[...].reshape(ts * B, E)                       # bf16
    xb2 = xb_ref[...].reshape(ts * B, E)                       # bf16
    gf = jnp.dot(xf2, wih_ref[0], preferred_element_type=jnp.float32) + bg_ref[...]
    gb = jnp.dot(xb2, wih_ref[1], preferred_element_type=jnp.float32)
    gf_scr[...] = gf.reshape(ts, B, 4 * H2)
    gb_scr[...] = gb.reshape(ts, B, 4 * H2)

    whh = whh_ref[...]          # [2H, 8H] bf16, VMEM-resident across the block

    # ---- serial recurrence: forward local step s and backward local step
    #      (ts-1-s) fused; one 256-wide bf16 MXU dot per timestep.
    #      Python loop => all ref indices are static (no dynamic-slice math).
    for s in range(ts):
        g_in = gf_scr[s] + gb_scr[ts - 1 - s]                  # [B, 8H] f32
        rec = jnp.dot(h_c[...].astype(jnp.bfloat16), whh,
                      preferred_element_type=jnp.float32)      # [B, 8H] f32
        gates = g_in + rec
        # One full-width sigmoid; g-gate columns were pre-scaled by 2 so
        # tanh(z) = 2*sigmoid(2z) - 1 recovers the cell candidate.
        sig = jax.nn.sigmoid(gates)
        i_g = sig[:, 0 * H2:1 * H2]
        f_g = sig[:, 1 * H2:2 * H2]
        g_g = 2.0 * sig[:, 2 * H2:3 * H2] - 1.0
        o_g = sig[:, 3 * H2:4 * H2]
        c_new = f_g * c_c[...] + i_g * g_g
        h_new = o_g * jnp.tanh(c_new)
        # Per-direction validity mask (padding is a suffix, so zeroing state on
        # padded steps reproduces pack_padded_sequence for both directions).
        m = jnp.concatenate([jnp.broadcast_to(mf_ref[s], (B, H)),
                             jnp.broadcast_to(mb_ref[ts - 1 - s], (B, H))],
                            axis=-1)
        c_c[...] = m * c_new
        h_m = m * h_new
        h_c[...] = h_m
        hf_scr[s] = h_m[:, :H].astype(jnp.bfloat16)            # fwd h at local time s
        hb_scr[ts - 1 - s] = h_m[:, H:].astype(jnp.bfloat16)   # bwd h at local time ts-1-s

    # ---- block epilogue: emission projection while h is still in VMEM
    #      (no HBM round-trip of the hidden states).
    emf = jnp.dot(hf_scr[...].reshape(ts * B, H), wlin_ref[0],
                  preferred_element_type=jnp.float32)
    emb = jnp.dot(hb_scr[...].reshape(ts * B, H), wlin_ref[1],
                  preferred_element_type=jnp.float32)
    emf_ref[...] = emf.reshape(ts, B, O)
    emb_ref[...] = emb.reshape(ts, B, O)


def bilstm_emissions(x_bf16, mask, wih_comb, bg_comb, whh_comb, w_lin, ts):
    """Run the fused BiLSTM kernel; returns forward/backward emission partials."""
    T, B, E = x_bf16.shape
    H8 = wih_comb.shape[-1]           # 8H
    H = H8 // 8
    O = w_lin.shape[-1]
    n_tb = T // ts

    fwd = lambda t: (t, 0, 0)                 # forward time blocks, ascending
    bwd = lambda t: (n_tb - 1 - t, 0, 0)      # backward time blocks, descending

    return pl.pallas_call(
        _bilstm_fused_kernel,
        out_shape=(jax.ShapeDtypeStruct((T, B, O), jnp.float32),
                   jax.ShapeDtypeStruct((T, B, O), jnp.float32)),
        grid_spec=pltpu.PrefetchScalarGridSpec(
            num_scalar_prefetch=0,
            grid=(n_tb,),
            in_specs=[
                pl.BlockSpec((ts, B, E), fwd),          # x, forward view
                pl.BlockSpec((ts, B, E), bwd),          # x, backward view
                pl.BlockSpec((ts, B, 1), fwd),          # mask, forward view
                pl.BlockSpec((ts, B, 1), bwd),          # mask, backward view
                pl.BlockSpec((2, E, H8), lambda t: (0, 0, 0)),   # W_ih (interleaved, per dir)
                pl.BlockSpec((1, H8), lambda t: (0, 0)),         # combined bias
                pl.BlockSpec((2 * H, H8), lambda t: (0, 0)),     # block-diag W_hh
                pl.BlockSpec((2, H, O), lambda t: (0, 0, 0)),    # Linear weight halves
            ],
            out_specs=[
                pl.BlockSpec((ts, B, O), fwd),          # forward emission contribution
                pl.BlockSpec((ts, B, O), bwd),          # backward emission contribution
            ],
            scratch_shapes=[
                pltpu.VMEM((ts, B, H8), jnp.float32),   # fwd input-gates for the block
                pltpu.VMEM((ts, B, H8), jnp.float32),   # bwd input-gates for the block
                pltpu.VMEM((ts, B, H), jnp.bfloat16),   # fwd h for the block (epilogue)
                pltpu.VMEM((ts, B, H), jnp.bfloat16),   # bwd h for the block (epilogue)
                pltpu.VMEM((B, 2 * H), jnp.float32),    # h carry [h_fwd | h_bwd]
                pltpu.VMEM((B, 2 * H), jnp.float32),    # c carry
            ],
        ),
        compiler_params=pltpu.CompilerParams(
            dimension_semantics=("arbitrary",),          # time axis carries the recurrence
            vmem_limit_bytes=_vmem_limit_bytes(),
        ),
    )(x_bf16, x_bf16, mask, mask, wih_comb, bg_comb, whh_comb, w_lin)


# ----------------------------------------------------------------------------
# Parameter preparation: interleaved / block-diagonal layouts + g-gate prescale.
# ----------------------------------------------------------------------------
def _prepare_kernel_params(params):
    w_ih, w_hh, b_g, w_lin = (params["w_ih"], params["w_hh"],
                              params["b_g"], params["w_lin"])
    H = w_hh.shape[1]

    # Pre-scale the g-gate (cell candidate) columns by 2 so the kernel can use
    # tanh(z) = 2*sigmoid(2z) - 1 with one full-width sigmoid.
    gscale = jnp.concatenate([jnp.ones((H,), jnp.float32),
                              jnp.ones((H,), jnp.float32),
                              jnp.full((H,), 2.0, jnp.float32),
                              jnp.ones((H,), jnp.float32)])
    w_ih_s = w_ih * gscale
    w_hh_s = w_hh * gscale
    b_g_s = b_g * gscale

    def interleave(f, b):
        # per-direction gate blocks (i,f,g,o each H) -> [i_f i_b | f_f f_b | g_f g_b | o_f o_b]
        parts = []
        for k in range(4):
            parts.append(f[..., k * H:(k + 1) * H])
            parts.append(b[..., k * H:(k + 1) * H])
        return jnp.concatenate(parts, axis=-1)

    zE = jnp.zeros_like(w_ih_s[0])
    wih_comb = jnp.stack([interleave(w_ih_s[0], zE),      # fwd weights -> fwd columns
                          interleave(zE, w_ih_s[1])], 0)  # bwd weights -> bwd columns
    zH = jnp.zeros_like(w_hh_s[0])
    whh_comb = jnp.concatenate([interleave(w_hh_s[0], zH),   # rows 0:H  (h_fwd)
                                interleave(zH, w_hh_s[1])],  # rows H:2H (h_bwd)
                               axis=0)
    bg_comb = interleave(b_g_s[0], b_g_s[1])               # [1, 8H]

    return (wih_comb.astype(jnp.bfloat16),
            bg_comb.astype(jnp.float32),
            whh_comb.astype(jnp.bfloat16),
            w_lin.astype(jnp.bfloat16))


# ----------------------------------------------------------------------------
# Wrapper: BiLSTM_CRF.forward
# ----------------------------------------------------------------------------
def bilstm_crf_forward(params, sents, lengths):
    B, L = sents.shape
    T = L

    # Pad batch to a full sublane tile (multiple of 8); padded rows get length 0
    # so their states stay zero and are sliced off at the end.
    B_pad = ((B + 7) // 8) * 8
    sents_p = jnp.pad(sents, ((0, B_pad - B), (0, 0)))
    lengths_p = jnp.pad(lengths.astype(jnp.int32), (0, B_pad - B))

    # Embedding lookup (XLA gather glue), time-major, cast to bf16 (halves the
    # x HBM traffic; x is read once per direction).
    x_tbe = jnp.take(params["embedding"], sents_p.T, axis=0).astype(jnp.bfloat16)

    # Validity mask emulating pack_padded_sequence: [T, B_pad, 1].
    mask = (jnp.arange(T, dtype=jnp.int32)[:, None] < lengths_p[None, :])
    mask = mask.astype(jnp.float32)[:, :, None]

    wih_comb, bg_comb, whh_comb, w_lin_b = _prepare_kernel_params(params)

    ts = _pick_time_tile(T, 32)   # timesteps per grid step (also the unroll length)

    emf, emb = bilstm_emissions(x_tbe, mask, wih_comb, bg_comb, whh_comb,
                                w_lin_b, ts)

    # emission = fwd contribution + bwd contribution + Linear bias.
    # Padded steps: both contributions are 0 -> emission == bias, matching
    # nn.Linear applied to the zero-padded LSTM output.
    emission_tbo = emf + emb + params["b_lin"]                # [T, Bp, O]
    emission = jnp.transpose(emission_tbo, (1, 0, 2))[:B]     # [B, L, O]

    # Per the TPU review: keep the O^2 CRF broadcast in XLA so the big
    # [B, L, O, O] tensor is written lane-dense.
    crf_scores = emission[:, :, None, :] + params["transition"][None, None, :, :]
    return crf_scores


def init_params(key, vocab_size, emb_size, hidden_size, out_size):
    """Parameter layouts (PyTorch mapping in comments). Gate order is i, f, g, o.

      w_ih[d]  = weight_ih_l0(_reverse).T            -> [E, 4H]
      w_hh[d]  = weight_hh_l0(_reverse).T            -> [H, 4H]
      b_g[d]   = (bias_ih_l0 + bias_hh_l0)(_reverse) -> [1, 4H]   (biases summed)
      w_lin[0] = Linear.weight[:, :H].T  (forward half)   -> [H, O]
      w_lin[1] = Linear.weight[:, H:].T  (backward half)  -> [H, O]
    """
    ks = jax.random.split(key, 6)
    s = 0.1
    H, E, O = hidden_size, emb_size, out_size
    return {
        "embedding": s * jax.random.normal(ks[0], (vocab_size, E), jnp.float32),
        "w_ih": s * jax.random.normal(ks[1], (2, E, 4 * H), jnp.float32),
        "w_hh": s * jax.random.normal(ks[2], (2, H, 4 * H), jnp.float32),
        "b_g":  s * jax.random.normal(ks[3], (2, 1, 4 * H), jnp.float32),
        "w_lin": s * jax.random.normal(ks[4], (2, H, O), jnp.float32),
        "b_lin": s * jax.random.normal(ks[5], (1, O), jnp.float32),
        # CRF transition matrix, as in the module: ones(O, O) / O
        "transition": jnp.ones((O, O), jnp.float32) / O,
    }


if __name__ == "__main__":
    vocab_size, emb_size, hidden_size, out_size = 16, 8, 32, 8
    B, L = 2, 8

    key = jax.random.PRNGKey(0)
    k_param, k_sent = jax.random.split(key)
    params = init_params(k_param, vocab_size, emb_size, hidden_size, out_size)

    sents = jax.random.randint(k_sent, (B, L), 0, vocab_size, dtype=jnp.int32)
    lengths = jnp.array([8, 6], dtype=jnp.int32)   # descending, like pack_padded_sequence

    crf_scores = jax.jit(bilstm_crf_forward)(params, sents, lengths)
    crf_scores = jax.block_until_ready(crf_scores)

    assert crf_scores.shape == (B, L, out_size, out_size)
    assert bool(jnp.all(jnp.isfinite(crf_scores)))
    print("KERNEL_OK")
</pallas_src>

<mosaic_0001>
module attributes {stable_mosaic.version = 11 : i64} {
  func.func @_bilstm_fused_kernel(%arg0: i32, %arg1: memref<8x8x8xbf16, #tpu.memory_space<vmem>>, %arg2: memref<8x8x8xbf16, #tpu.memory_space<vmem>>, %arg3: memref<8x8x1xf32, #tpu.memory_space<vmem>>, %arg4: memref<8x8x1xf32, #tpu.memory_space<vmem>>, %arg5: memref<2x8x256xbf16, #tpu.memory_space<vmem>>, %arg6: memref<1x256xf32, #tpu.memory_space<vmem>>, %arg7: memref<64x256xbf16, #tpu.memory_space<vmem>>, %arg8: memref<2x32x8xbf16, #tpu.memory_space<vmem>>, %arg9: memref<8x8x8xf32, #tpu.memory_space<vmem>>, %arg10: memref<8x8x8xf32, #tpu.memory_space<vmem>>, %arg11: memref<8x8x256xf32, #tpu.memory_space<vmem>>, %arg12: memref<8x8x256xf32, #tpu.memory_space<vmem>>, %arg13: memref<8x8x32xbf16, #tpu.memory_space<vmem>>, %arg14: memref<8x8x32xbf16, #tpu.memory_space<vmem>>, %arg15: memref<8x64xf32, #tpu.memory_space<vmem>>, %arg16: memref<8x64xf32, #tpu.memory_space<vmem>>) attributes {dimension_semantics = [#tpu.dimension_semantics<arbitrary>], iteration_bounds = array<i64: 1>, scalar_prefetch = 0 : i64, scratch_operands = 6 : i64, tpu.core_type = #tpu.core_type<tc>, window_params = [{transform_indices = @transform_0, window_bounds = array<i64: 8, 8, 8>}, {transform_indices = @transform_1, window_bounds = array<i64: 8, 8, 8>}, {transform_indices = @transform_2, window_bounds = array<i64: 8, 8, 1>}, {transform_indices = @transform_3, window_bounds = array<i64: 8, 8, 1>}, {pipeline_mode = #tpu.pipeline_mode<synchronous>, transform_indices = @transform_4, window_bounds = array<i64: 2, 8, 256>}, {pipeline_mode = #tpu.pipeline_mode<synchronous>, transform_indices = @transform_5, window_bounds = array<i64: 1, 256>}, {pipeline_mode = #tpu.pipeline_mode<synchronous>, transform_indices = @transform_6, window_bounds = array<i64: 64, 256>}, {pipeline_mode = #tpu.pipeline_mode<synchronous>, transform_indices = @transform_7, window_bounds = array<i64: 2, 32, 8>}, {transform_indices = @transform_8, window_bounds = array<i64: 8, 8, 8>}, {transform_indices = @transform_9, window_bounds = array<i64: 8, 8, 8>}]} {
    %c0_i32 = arith.constant 0 : i32
    %0 = arith.cmpi eq, %arg0, %c0_i32 : i32
    %1 = arith.extui %0 : i1 to i32
    %c0_i32_0 = arith.constant 0 : i32
    %2 = arith.cmpi ne, %1, %c0_i32_0 : i32
    scf.if %2 {
      %cst_276 = arith.constant 0.000000e+00 : f32
      %443 = vector.broadcast %cst_276 : f32 to vector<8x64xf32>
      %c0_277 = arith.constant 0 : index
      %c0_278 = arith.constant 0 : index
      %444 = vector.load %arg15[%c0_277, %c0_278] : memref<8x64xf32, #tpu.memory_space<vmem>>, vector<8x64xf32>
      tpu.vector_store %arg15[%c0_277, %c0_278], %443 {strides = array<i32>} : memref<8x64xf32, #tpu.memory_space<vmem>>, vector<8x64xf32>,
      %cst_279 = arith.constant 0.000000e+00 : f32
      %445 = vector.broadcast %cst_279 : f32 to vector<8x64xf32>
      %c0_280 = arith.constant 0 : index
      %c0_281 = arith.constant 0 : index
      %446 = vector.load %arg16[%c0_280, %c0_281] : memref<8x64xf32, #tpu.memory_space<vmem>>, vector<8x64xf32>
      tpu.vector_store %arg16[%c0_280, %c0_281], %445 {strides = array<i32>} : memref<8x64xf32, #tpu.memory_space<vmem>>, vector<8x64xf32>,
    } else {
    }
    %c0 = arith.constant 0 : index
    %c0_1 = arith.constant 0 : index
    %c0_2 = arith.constant 0 : index
    %3 = vector.load %arg1[%c0, %c0_1, %c0_2] : memref<8x8x8xbf16, #tpu.memory_space<vmem>>, vector<8x8x8xbf16>
    %4 = vector.shape_cast %3 : vector<8x8x8xbf16> to vector<64x8xbf16>
    %c0_3 = arith.constant 0 : index
    %c0_4 = arith.constant 0 : index
    %c0_5 = arith.constant 0 : index
    %5 = vector.load %arg2[%c0_3, %c0_4, %c0_5] : memref<8x8x8xbf16, #tpu.memory_space<vmem>>, vector<8x8x8xbf16>
    %6 = vector.shape_cast %5 : vector<8x8x8xbf16> to vector<64x8xbf16>
    %c0_6 = arith.constant 0 : index
    %c0_7 = arith.constant 0 : index
    %c0_8 = arith.constant 0 : index
    %7 = vector.load %arg5[%c0_6, %c0_7, %c0_8] : memref<2x8x256xbf16, #tpu.memory_space<vmem>>, vector<1x8x256xbf16>
    %8 = vector.shape_cast %7 : vector<1x8x256xbf16> to vector<8x256xbf16>
    %cst = arith.constant dense<0.000000e+00> : vector<64x256xf32>
    %9 = tpu.matmul %4, %8, %cst {dimension_numbers = #tpu.dot_dimension_numbers<[1], [0], [0], [1], [0, 0, 1, 1], [], []>} : vector<64x8xbf16>, vector<8x256xbf16>, vector<64x256xf32> -> vector<64x256xf32>
    %c0_9 = arith.constant 0 : index
    %c0_10 = arith.constant 0 : index
    %10 = vector.load %arg6[%c0_9, %c0_10] : memref<1x256xf32, #tpu.memory_space<vmem>>, vector<1x256xf32>
    %11 = vector.broadcast %10 : vector<1x256xf32> to vector<64x256xf32>
    %12 = arith.addf %9, %11 : vector<64x256xf32>
    %c1 = arith.constant 1 : index
    %c0_11 = arith.constant 0 : index
    %c0_12 = arith.constant 0 : index
    %13 = vector.load %arg5[%c1, %c0_11, %c0_12] : memref<2x8x256xbf16, #tpu.memory_space<vmem>>, vector<1x8x256xbf16>
    %14 = vector.shape_cast %13 : vector<1x8x256xbf16> to vector<8x256xbf16>
    %cst_13 = arith.constant dense<0.000000e+00> : vector<64x256xf32>
    %15 = tpu.matmul %6, %14, %cst_13 {dimension_numbers = #tpu.dot_dimension_numbers<[1], [0], [0], [1], [0, 0, 1, 1], [], []>} : vector<64x8xbf16>, vector<8x256xbf16>, vector<64x256xf32> -> vector<64x256xf32>
    %16 = vector.shape_cast %12 : vector<64x256xf32> to vector<8x8x256xf32>
    %c0_14 = arith.constant 0 : index
    %c0_15 = arith.constant 0 : index
    %c0_16 = arith.constant 0 : index
    %17 = vector.load %arg11[%c0_14, %c0_15, %c0_16] : memref<8x8x256xf32, #tpu.memory_space<vmem>>, vector<8x8x256xf32>
    tpu.vector_store %arg11[%c0_14, %c0_15, %c0_16], %16 {strides = array<i32>} : memref<8x8x256xf32, #tpu.memory_space<vmem>>, vector<8x8x256xf32>,
    %18 = vector.shape_cast %15 : vector<64x256xf32> to vector<8x8x256xf32>
    %c0_17 = arith.constant 0 : index
    %c0_18 = arith.constant 0 : index
    %c0_19 = arith.constant 0 : index
    %19 = vector.load %arg12[%c0_17, %c0_18, %c0_19] : memref<8x8x256xf32, #tpu.memory_space<vmem>>, vector<8x8x256xf32>
    tpu.vector_store %arg12[%c0_17, %c0_18, %c0_19], %18 {strides = array<i32>} : memref<8x8x256xf32, #tpu.memory_space<vmem>>, vector<8x8x256xf32>,
    %c0_20 = arith.constant 0 : index
    %c0_21 = arith.constant 0 : index
    %20 = vector.load %arg7[%c0_20, %c0_21] : memref<64x256xbf16, #tpu.memory_space<vmem>>, vector<64x256xbf16>
    %c0_22 = arith.constant 0 : index
    %c0_23 = arith.constant 0 : index
    %c0_24 = arith.constant 0 : index
    %21 = vector.load %arg11[%c0_22, %c0_23, %c0_24] : memref<8x8x256xf32, #tpu.memory_space<vmem>>, vector<1x8x256xf32>
    %22 = vector.shape_cast %21 : vector<1x8x256xf32> to vector<8x256xf32>
    %c7 = arith.constant 7 : index
    %c0_25 = arith.constant 0 : index
    %c0_26 = arith.constant 0 : index
    %23 = vector.load %arg12[%c7, %c0_25, %c0_26] : memref<8x8x256xf32, #tpu.memory_space<vmem>>, vector<1x8x256xf32>
    %24 = vector.shape_cast %23 : vector<1x8x256xf32> to vector<8x256xf32>
    %25 = arith.addf %22, %24 : vector<8x256xf32>
    %c0_27 = arith.constant 0 : index
    %c0_28 = arith.constant 0 : index
    %26 = vector.load %arg15[%c0_27, %c0_28] : memref<8x64xf32, #tpu.memory_space<vmem>>, vector<8x64xf32>
    %27 = arith.truncf %26 : vector<8x64xf32> to vector<8x64xbf16>
    %cst_29 = arith.constant dense<0.000000e+00> : vector<8x256xf32>
    %28 = tpu.matmul %27, %20, %cst_29 {dimension_numbers = #tpu.dot_dimension_numbers<[1], [0], [0], [1], [0, 0, 1, 1], [], []>} : vector<8x64xbf16>, vector<64x256xbf16>, vector<8x256xf32> -> vector<8x256xf32>
    %29 = arith.addf %25, %28 : vector<8x256xf32>
    %30 = arith.negf %29 : vector<8x256xf32>
    %31 = math.exp %30 : vector<8x256xf32>
    %cst_30 = arith.constant 1.000000e+00 : f32
    %32 = vector.broadcast %cst_30 : f32 to vector<8x256xf32>
    %33 = arith.addf %32, %31 : vector<8x256xf32>
    %34 = arith.divf %32, %33 : vector<8x256xf32>
    %35 = vector.extract_strided_slice %34 {offsets = [0, 0], sizes = [8, 64], strides = [1, 1]} : vector<8x256xf32> to vector<8x64xf32>
    %36 = vector.extract_strided_slice %34 {offsets = [0, 64], sizes = [8, 64], strides = [1, 1]} : vector<8x256xf32> to vector<8x64xf32>
    %37 = vector.extract_strided_slice %34 {offsets = [0, 128], sizes = [8, 64], strides = [1, 1]} : vector<8x256xf32> to vector<8x64xf32>
    %cst_31 = arith.constant 2.000000e+00 : f32
    %38 = vector.broadcast %cst_31 : f32 to vector<8x64xf32>
    %39 = arith.mulf %38, %37 : vector<8x64xf32>
    %cst_32 = arith.constant 1.000000e+00 : f32
    %40 = vector.broadcast %cst_32 : f32 to vector<8x64xf32>
    %41 = arith.subf %39, %40 : vector<8x64xf32>
    %42 = vector.extract_strided_slice %34 {offsets = [0, 192], sizes = [8, 64], strides = [1, 1]} : vector<8x256xf32> to vector<8x64xf32>
    %c0_33 = arith.constant 0 : index
    %c0_34 = arith.constant 0 : index
    %43 = vector.load %arg16[%c0_33, %c0_34] : memref<8x64xf32, #tpu.memory_space<vmem>>, vector<8x64xf32>
    %44 = arith.mulf %36, %43 : vector<8x64xf32>
    %45 = arith.mulf %35, %41 : vector<8x64xf32>
    %46 = arith.addf %44, %45 : vector<8x64xf32>
    %47 = math.tanh %46 : vector<8x64xf32>
    %48 = arith.mulf %42, %47 : vector<8x64xf32>
    %c0_35 = arith.constant 0 : index
    %c0_36 = arith.constant 0 : index
    %c0_37 = arith.constant 0 : index
    %49 = vector.load %arg3[%c0_35, %c0_36, %c0_37] : memref<8x8x1xf32, #tpu.memory_space<vmem>>, vector<1x8x1xf32>
    %50 = vector.shape_cast %49 : vector<1x8x1xf32> to vector<8x1xf32>
    %51 = vector.shape_cast %50 : vector<8x1xf32> to vector<8x1xf32>
    %52 = vector.broadcast %51 : vector<8x1xf32> to vector<8x32xf32>
    %c7_38 = arith.constant 7 : index
    %c0_39 = arith.constant 0 : index
    %c0_40 = arith.constant 0 : index
    %53 = vector.load %arg4[%c7_38, %c0_39, %c0_40] : memref<8x8x1xf32, #tpu.memory_space<vmem>>, vector<1x8x1xf32>
    %54 = vector.shape_cast %53 : vector<1x8x1xf32> to vector<8x1xf32>
    %55 = vector.shape_cast %54 : vector<8x1xf32> to vector<8x1xf32>
    %56 = vector.broadcast %55 : vector<8x1xf32> to vector<8x32xf32>
    %57 = tpu.concatenate %52, %56 in 1 : vector<8x32xf32>, vector<8x32xf32> -> vector<8x64xf32>
    %58 = arith.mulf %57, %46 : vector<8x64xf32>
    %c0_41 = arith.constant 0 : index
    %c0_42 = arith.constant 0 : index
    %59 = vector.load %arg16[%c0_41, %c0_42] : memref<8x64xf32, #tpu.memory_space<vmem>>, vector<8x64xf32>
    tpu.vector_store %arg16[%c0_41, %c0_42], %58 {strides = array<i32>} : memref<8x64xf32, #tpu.memory_space<vmem>>, vector<8x64xf32>,
    %60 = arith.mulf %57, %48 : vector<8x64xf32>
    %c0_43 = arith.constant 0 : index
    %c0_44 = arith.constant 0 : index
    %61 = vector.load %arg15[%c0_43, %c0_44] : memref<8x64xf32, #tpu.memory_space<vmem>>, vector<8x64xf32>
    tpu.vector_store %arg15[%c0_43, %c0_44], %60 {strides = array<i32>} : memref<8x64xf32, #tpu.memory_space<vmem>>, vector<8x64xf32>,
    %62 = vector.extract_strided_slice %60 {offsets = [0, 0], sizes = [8, 32], strides = [1, 1]} : vector<8x64xf32> to vector<8x32xf32>
    %63 = arith.truncf %62 : vector<8x32xf32> to vector<8x32xbf16>
    %c0_45 = arith.constant 0 : index
    %c0_46 = arith.constant 0 : index
    %c0_47 = arith.constant 0 : index
    %64 = vector.load %arg13[%c0_45, %c0_46, %c0_47] : memref<8x8x32xbf16, #tpu.memory_space<vmem>>, vector<1x8x32xbf16>
    %65 = vector.shape_cast %64 : vector<1x8x32xbf16> to vector<8x32xbf16>
    %66 = vector.shape_cast %63 : vector<8x32xbf16> to vector<1x8x32xbf16>
    tpu.vector_store %arg13[%c0_45, %c0_46, %c0_47], %66 {strides = array<i32>} : memref<8x8x32xbf16, #tpu.memory_space<vmem>>, vector<1x8x32xbf16>,
    %67 = vector.extract_strided_slice %60 {offsets = [0, 32], sizes = [8, 32], strides = [1, 1]} : vector<8x64xf32> to vector<8x32xf32>
    %68 = arith.truncf %67 : vector<8x32xf32> to vector<8x32xbf16>
    %c7_48 = arith.constant 7 : index
    %c0_49 = arith.constant 0 : index
    %c0_50 = arith.constant 0 : index
    %69 = vector.load %arg14[%c7_48, %c0_49, %c0_50] : memref<8x8x32xbf16, #tpu.memory_space<vmem>>, vector<1x8x32xbf16>
    %70 = vector.shape_cast %69 : vector<1x8x32xbf16> to vector<8x32xbf16>
    %71 = vector.shape_cast %68 : vector<8x32xbf16> to vector<1x8x32xbf16>
    tpu.vector_store %arg14[%c7_48, %c0_49, %c0_50], %71 {strides = array<i32>} : memref<8x8x32xbf16, #tpu.memory_space<vmem>>, vector<1x8x32xbf16>,
    %c1_51 = arith.constant 1 : index
    %c0_52 = arith.constant 0 : index
    %c0_53 = arith.constant 0 : index
    %72 = vector.load %arg11[%c1_51, %c0_52, %c0_53] : memref<8x8x256xf32, #tpu.memory_space<vmem>>, vector<1x8x256xf32>
    %73 = vector.shape_cast %72 : vector<1x8x256xf32> to vector<8x256xf32>
    %c6 = arith.constant 6 : index
    %c0_54 = arith.constant 0 : index
    %c0_55 = arith.constant 0 : index
    %74 = vector.load %arg12[%c6, %c0_54, %c0_55] : memref<8x8x256xf32, #tpu.memory_space<vmem>>, vector<1x8x256xf32>
    %75 = vector.shape_cast %74 : vector<1x8x256xf32> to vector<8x256xf32>
    %76 = arith.addf %73, %75 : vector<8x256xf32>
    %c0_56 = arith.constant 0 : index
    %c0_57 = arith.constant 0 : index
    %77 = vector.load %arg15[%c0_56, %c0_57] : memref<8x64xf32, #tpu.memory_space<vmem>>, vector<8x64xf32>
    %78 = arith.truncf %77 : vector<8x64xf32> to vector<8x64xbf16>
    %cst_58 = arith.constant dense<0.000000e+00> : vector<8x256xf32>
    %79 = tpu.matmul %78, %20, %cst_58 {dimension_numbers = #tpu.dot_dimension_numbers<[1], [0], [0], [1], [0, 0, 1, 1], [], []>} : vector<8x64xbf16>, vector<64x256xbf16>, vector<8x256xf32> -> vector<8x256xf32>
    %80 = arith.addf %76, %79 : vector<8x256xf32>
    %81 = arith.negf %80 : vector<8x256xf32>
    %82 = math.exp %81 : vector<8x256xf32>
    %cst_59 = arith.constant 1.000000e+00 : f32
    %83 = vector.broadcast %cst_59 : f32 to vector<8x256xf32>
    %84 = arith.addf %83, %82 : vector<8x256xf32>
    %85 = arith.divf %83, %84 : vector<8x256xf32>
    %86 = vector.extract_strided_slice %85 {offsets = [0, 0], sizes = [8, 64], strides = [1, 1]} : vector<8x256xf32> to vector<8x64xf32>
    %87 = vector.extract_strided_slice %85 {offsets = [0, 64], sizes = [8, 64], strides = [1, 1]} : vector<8x256xf32> to vector<8x64xf32>
    %88 = vector.extract_strided_slice %85 {offsets = [0, 128], sizes = [8, 64], strides = [1, 1]} : vector<8x256xf32> to vector<8x64xf32>
    %cst_60 = arith.constant 2.000000e+00 : f32
    %89 = vector.broadcast %cst_60 : f32 to vector<8x64xf32>
    %90 = arith.mulf %89, %88 : vector<8x64xf32>
    %cst_61 = arith.constant 1.000000e+00 : f32
    %91 = vector.broadcast %cst_61 : f32 to vector<8x64xf32>
    %92 = arith.subf %90, %91 : vector<8x64xf32>
    %93 = vector.extract_strided_slice %85 {offsets = [0, 192], sizes = [8, 64], strides = [1, 1]} : vector<8x256xf32> to vector<8x64xf32>
    %c0_62 = arith.constant 0 : index
    %c0_63 = arith.constant 0 : index
    %94 = vector.load %arg16[%c0_62, %c0_63] : memref<8x64xf32, #tpu.memory_space<vmem>>, vector<8x64xf32>
    %95 = arith.mulf %87, %94 : vector<8x64xf32>
    %96 = arith.mulf %86, %92 : vector<8x64xf32>
    %97 = arith.addf %95, %96 : vector<8x64xf32>
    %98 = math.tanh %97 : vector<8x64xf32>
    %99 = arith.mulf %93, %98 : vector<8x64xf32>
    %c1_64 = arith.constant 1 : index
    %c0_65 = arith.constant 0 : index
    %c0_66 = arith.constant 0 : index
    %100 = vector.load %arg3[%c1_64, %c0_65, %c0_66] : memref<8x8x1xf32, #tpu.memory_space<vmem>>, vector<1x8x1xf32>
    %101 = vector.shape_cast %100 : vector<1x8x1xf32> to vector<8x1xf32>
    %102 = vector.shape_cast %101 : vector<8x1xf32> to vector<8x1xf32>
    %103 = vector.broadcast %102 : vector<8x1xf32> to vector<8x32xf32>
    %c6_67 = arith.constant 6 : index
    %c0_68 = arith.constant 0 : index
    %c0_69 = arith.constant 0 : index
    %104 = vector.load %arg4[%c6_67, %c0_68, %c0_69] : memref<8x8x1xf32, #tpu.memory_space<vmem>>, vector<1x8x1xf32>
    %105 = vector.shape_cast %104 : vector<1x8x1xf32> to vector<8x1xf32>
    %106 = vector.shape_cast %105 : vector<8x1xf32> to vector<8x1xf32>
    %107 = vector.broadcast %106 : vector<8x1xf32> to vector<8x32xf32>
    %108 = tpu.concatenate %103, %107 in 1 : vector<8x32xf32>, vector<8x32xf32> -> vector<8x64xf32>
    %109 = arith.mulf %108, %97 : vector<8x64xf32>
    %c0_70 = arith.constant 0 : index
    %c0_71 = arith.constant 0 : index
    %110 = vector.load %arg16[%c0_70, %c0_71] : memref<8x64xf32, #tpu.memory_space<vmem>>, vector<8x64xf32>
    tpu.vector_store %arg16[%c0_70, %c0_71], %109 {strides = array<i32>} : memref<8x64xf32, #tpu.memory_space<vmem>>, vector<8x64xf32>,
    %111 = arith.mulf %108, %99 : vector<8x64xf32>
    %c0_72 = arith.constant 0 : index
    %c0_73 = arith.constant 0 : index
    %112 = vector.load %arg15[%c0_72, %c0_73] : memref<8x64xf32, #tpu.memory_space<vmem>>, vector<8x64xf32>
    tpu.vector_store %arg15[%c0_72, %c0_73], %111 {strides = array<i32>} : memref<8x64xf32, #tpu.memory_space<vmem>>, vector<8x64xf32>,
    %113 = vector.extract_strided_slice %111 {offsets = [0, 0], sizes = [8, 32], strides = [1, 1]} : vector<8x64xf32> to vector<8x32xf32>
    %114 = arith.truncf %113 : vector<8x32xf32> to vector<8x32xbf16>
    %c1_74 = arith.constant 1 : index
    %c0_75 = arith.constant 0 : index
    %c0_76 = arith.constant 0 : index
    %115 = vector.load %arg13[%c1_74, %c0_75, %c0_76] : memref<8x8x32xbf16, #tpu.memory_space<vmem>>, vector<1x8x32xbf16>
    %116 = vector.shape_cast %115 : vector<1x8x32xbf16> to vector<8x32xbf16>
    %117 = vector.shape_cast %114 : vector<8x32xbf16> to vector<1x8x32xbf16>
    tpu.vector_store %arg13[%c1_74, %c0_75, %c0_76], %117 {strides = array<i32>} : memref<8x8x32xbf16, #tpu.memory_space<vmem>>, vector<1x8x32xbf16>,
    %118 = vector.extract_strided_slice %111 {offsets = [0, 32], sizes = [8, 32], strides = [1, 1]} : vector<8x64xf32> to vector<8x32xf32>
    %119 = arith.truncf %118 : vector<8x32xf32> to vector<8x32xbf16>
    %c6_77 = arith.constant 6 : index
    %c0_78 = arith.constant 0 : index
    %c0_79 = arith.constant 0 : index
    %120 = vector.load %arg14[%c6_77, %c0_78, %c0_79] : memref<8x8x32xbf16, #tpu.memory_space<vmem>>, vector<1x8x32xbf16>
    %121 = vector.shape_cast %120 : vector<1x8x32xbf16> to vector<8x32xbf16>
    %122 = vector.shape_cast %119 : vector<8x32xbf16> to vector<1x8x32xbf16>
    tpu.vector_store %arg14[%c6_77, %c0_78, %c0_79], %122 {strides = array<i32>} : memref<8x8x32xbf16, #tpu.memory_space<vmem>>, vector<1x8x32xbf16>,
    %c2 = arith.constant 2 : index
    %c0_80 = arith.constant 0 : index
    %c0_81 = arith.constant 0 : index
    %123 = vector.load %arg11[%c2, %c0_80, %c0_81] : memref<8x8x256xf32, #tpu.memory_space<vmem>>, vector<1x8x256xf32>
    %124 = vector.shape_cast %123 : vector<1x8x256xf32> to vector<8x256xf32>
    %c5 = arith.constant 5 : index
    %c0_82 = arith.constant 0 : index
    %c0_83 = arith.constant 0 : index
    %125 = vector.load %arg12[%c5, %c0_82, %c0_83] : memref<8x8x256xf32, #tpu.memory_space<vmem>>, vector<1x8x256xf32>
    %126 = vector.shape_cast %125 : vector<1x8x256xf32> to vector<8x256xf32>
    %127 = arith.addf %124, %126 : vector<8x256xf32>
    %c0_84 = arith.constant 0 : index
    %c0_85 = arith.constant 0 : index
    %128 = vector.load %arg15[%c0_84, %c0_85] : memref<8x64xf32, #tpu.memory_space<vmem>>, vector<8x64xf32>
    %129 = arith.truncf %128 : vector<8x64xf32> to vector<8x64xbf16>
    %cst_86 = arith.constant dense<0.000000e+00> : vector<8x256xf32>
    %130 = tpu.matmul %129, %20, %cst_86 {dimension_numbers = #tpu.dot_dimension_numbers<[1], [0], [0], [1], [0, 0, 1, 1], [], []>} : vector<8x64xbf16>, vector<64x256xbf16>, vector<8x256xf32> -> vector<8x256xf32>
    %131 = arith.addf %127, %130 : vector<8x256xf32>
    %132 = arith.negf %131 : vector<8x256xf32>
    %133 = math.exp %132 : vector<8x256xf32>
    %cst_87 = arith.constant 1.000000e+00 : f32
    %134 = vector.broadcast %cst_87 : f32 to vector<8x256xf32>
    %135 = arith.addf %134, %133 : vector<8x256xf32>
    %136 = arith.divf %134, %135 : vector<8x256xf32>
    %137 = vector.extract_strided_slice %136 {offsets = [0, 0], sizes = [8, 64], strides = [1, 1]} : vector<8x256xf32> to vector<8x64xf32>
    %138 = vector.extract_strided_slice %136 {offsets = [0, 64], sizes = [8, 64], strides = [1, 1]} : vector<8x256xf32> to vector<8x64xf32>
    %139 = vector.extract_strided_slice %136 {offsets = [0, 128], sizes = [8, 64], strides = [1, 1]} : vector<8x256xf32> to vector<8x64xf32>
    %cst_88 = arith.constant 2.000000e+00 : f32
    %140 = vector.broadcast %cst_88 : f32 to vector<8x64xf32>
    %141 = arith.mulf %140, %139 : vector<8x64xf32>
    %cst_89 = arith.constant 1.000000e+00 : f32
    %142 = vector.broadcast %cst_89 : f32 to vector<8x64xf32>
    %143 = arith.subf %141, %142 : vector<8x64xf32>
    %144 = vector.extract_strided_slice %136 {offsets = [0, 192], sizes = [8, 64], strides = [1, 1]} : vector<8x256xf32> to vector<8x64xf32>
    %c0_90 = arith.constant 0 : index
    %c0_91 = arith.constant 0 : index
    %145 = vector.load %arg16[%c0_90, %c0_91] : memref<8x64xf32, #tpu.memory_space<vmem>>, vector<8x64xf32>
    %146 = arith.mulf %138, %145 : vector<8x64xf32>
    %147 = arith.mulf %137, %143 : vector<8x64xf32>
    %148 = arith.addf %146, %147 : vector<8x64xf32>
    %149 = math.tanh %148 : vector<8x64xf32>
    %150 = arith.mulf %144, %149 : vector<8x64xf32>
    %c2_92 = arith.constant 2 : index
    %c0_93 = arith.constant 0 : index
    %c0_94 = arith.constant 0 : index
    %151 = vector.load %arg3[%c2_92, %c0_93, %c0_94] : memref<8x8x1xf32, #tpu.memory_space<vmem>>, vector<1x8x1xf32>
    %152 = vector.shape_cast %151 : vector<1x8x1xf32> to vector<8x1xf32>
    %153 = vector.shape_cast %152 : vector<8x1xf32> to vector<8x1xf32>
    %154 = vector.broadcast %153 : vector<8x1xf32> to vector<8x32xf32>
    %c5_95 = arith.constant 5 : index
    %c0_96 = arith.constant 0 : index
    %c0_97 = arith.constant 0 : index
    %155 = vector.load %arg4[%c5_95, %c0_96, %c0_97] : memref<8x8x1xf32, #tpu.memory_space<vmem>>, vector<1x8x1xf32>
    %156 = vector.shape_cast %155 : vector<1x8x1xf32> to vector<8x1xf32>
    %157 = vector.shape_cast %156 : vector<8x1xf32> to vector<8x1xf32>
    %158 = vector.broadcast %157 : vector<8x1xf32> to vector<8x32xf32>
    %159 = tpu.concatenate %154, %158 in 1 : vector<8x32xf32>, vector<8x32xf32> -> vector<8x64xf32>
    %160 = arith.mulf %159, %148 : vector<8x64xf32>
    %c0_98 = arith.constant 0 : index
    %c0_99 = arith.constant 0 : index
    %161 = vector.load %arg16[%c0_98, %c0_99] : memref<8x64xf32, #tpu.memory_space<vmem>>, vector<8x64xf32>
    tpu.vector_store %arg16[%c0_98, %c0_99], %160 {strides = array<i32>} : memref<8x64xf32, #tpu.memory_space<vmem>>, vector<8x64xf32>,
    %162 = arith.mulf %159, %150 : vector<8x64xf32>
    %c0_100 = arith.constant 0 : index
    %c0_101 = arith.constant 0 : index
    %163 = vector.load %arg15[%c0_100, %c0_101] : memref<8x64xf32, #tpu.memory_space<vmem>>, vector<8x64xf32>
    tpu.vector_store %arg15[%c0_100, %c0_101], %162 {strides = array<i32>} : memref<8x64xf32, #tpu.memory_space<vmem>>, vector<8x64xf32>,
    %164 = vector.extract_strided_slice %162 {offsets = [0, 0], sizes = [8, 32], strides = [1, 1]} : vector<8x64xf32> to vector<8x32xf32>
    %165 = arith.truncf %164 : vector<8x32xf32> to vector<8x32xbf16>
    %c2_102 = arith.constant 2 : index
    %c0_103 = arith.constant 0 : index
    %c0_104 = arith.constant 0 : index
    %166 = vector.load %arg13[%c2_102, %c0_103, %c0_104] : memref<8x8x32xbf16, #tpu.memory_space<vmem>>, vector<1x8x32xbf16>
    %167 = vector.shape_cast %166 : vector<1x8x32xbf16> to vector<8x32xbf16>
    %168 = vector.shape_cast %165 : vector<8x32xbf16> to vector<1x8x32xbf16>
    tpu.vector_store %arg13[%c2_102, %c0_103, %c0_104], %168 {strides = array<i32>} : memref<8x8x32xbf16, #tpu.memory_space<vmem>>, vector<1x8x32xbf16>,
    %169 = vector.extract_strided_slice %162 {offsets = [0, 32], sizes = [8, 32], strides = [1, 1]} : vector<8x64xf32> to vector<8x32xf32>
    %170 = arith.truncf %169 : vector<8x32xf32> to vector<8x32xbf16>
    %c5_105 = arith.constant 5 : index
    %c0_106 = arith.constant 0 : index
    %c0_107 = arith.constant 0 : index
    %171 = vector.load %arg14[%c5_105, %c0_106, %c0_107] : memref<8x8x32xbf16, #tpu.memory_space<vmem>>, vector<1x8x32xbf16>
    %172 = vector.shape_cast %171 : vector<1x8x32xbf16> to vector<8x32xbf16>
    %173 = vector.shape_cast %170 : vector<8x32xbf16> to vector<1x8x32xbf16>
    tpu.vector_store %arg14[%c5_105, %c0_106, %c0_107], %173 {strides = array<i32>} : memref<8x8x32xbf16, #tpu.memory_space<vmem>>, vector<1x8x32xbf16>,
    %c3 = arith.constant 3 : index
    %c0_108 = arith.constant 0 : index
    %c0_109 = arith.constant 0 : index
    %174 = vector.load %arg11[%c3, %c0_108, %c0_109] : memref<8x8x256xf32, #tpu.memory_space<vmem>>, vector<1x8x256xf32>
    %175 = vector.shape_cast %174 : vector<1x8x256xf32> to vector<8x256xf32>
    %c4 = arith.constant 4 : index
    %c0_110 = arith.constant 0 : index
    %c0_111 = arith.constant 0 : index
    %176 = vector.load %arg12[%c4, %c0_110, %c0_111] : memref<8x8x256xf32, #tpu.memory_space<vmem>>, vector<1x8x256xf32>
    %177 = vector.shape_cast %176 : vector<1x8x256xf32> to vector<8x256xf32>
    %178 = arith.addf %175, %177 : vector<8x256xf32>
    %c0_112 = arith.constant 0 : index
    %c0_113 = arith.constant 0 : index
    %179 = vector.load %arg15[%c0_112, %c0_113] : memref<8x64xf32, #tpu.memory_space<vmem>>, vector<8x64xf32>
    %180 = arith.truncf %179 : vector<8x64xf32> to vector<8x64xbf16>
    %cst_114 = arith.constant dense<0.000000e+00> : vector<8x256xf32>
    %181 = tpu.matmul %180, %20, %cst_114 {dimension_numbers = #tpu.dot_dimension_numbers<[1], [0], [0], [1], [0, 0, 1, 1], [], []>} : vector<8x64xbf16>, vector<64x256xbf16>, vector<8x256xf32> -> vector<8x256xf32>
    %182 = arith.addf %178, %181 : vector<8x256xf32>
    %183 = arith.negf %182 : vector<8x256xf32>
    %184 = math.exp %183 : vector<8x256xf32>
    %cst_115 = arith.constant 1.000000e+00 : f32
    %185 = vector.broadcast %cst_115 : f32 to vector<8x256xf32>
    %186 = arith.addf %185, %184 : vector<8x256xf32>
    %187 = arith.divf %185, %186 : vector<8x256xf32>
    %188 = vector.extract_strided_slice %187 {offsets = [0, 0], sizes = [8, 64], strides = [1, 1]} : vector<8x256xf32> to vector<8x64xf32>
    %189 = vector.extract_strided_slice %187 {offsets = [0, 64], sizes = [8, 64], strides = [1, 1]} : vector<8x256xf32> to vector<8x64xf32>
    %190 = vector.extract_strided_slice %187 {offsets = [0, 128], sizes = [8, 64], strides = [1, 1]} : vector<8x256xf32> to vector<8x64xf32>
    %cst_116 = arith.constant 2.000000e+00 : f32
    %191 = vector.broadcast %cst_116 : f32 to vector<8x64xf32>
    %192 = arith.mulf %191, %190 : vector<8x64xf32>
    %cst_117 = arith.constant 1.000000e+00 : f32
    %193 = vector.broadcast %cst_117 : f32 to vector<8x64xf32>
    %194 = arith.subf %192, %193 : vector<8x64xf32>
    %195 = vector.extract_strided_slice %187 {offsets = [0, 192], sizes = [8, 64], strides = [1, 1]} : vector<8x256xf32> to vector<8x64xf32>
    %c0_118 = arith.constant 0 : index
    %c0_119 = arith.constant 0 : index
    %196 = vector.load %arg16[%c0_118, %c0_119] : memref<8x64xf32, #tpu.memory_space<vmem>>, vector<8x64xf32>
    %197 = arith.mulf %189, %196 : vector<8x64xf32>
    %198 = arith.mulf %188, %194 : vector<8x64xf32>
    %199 = arith.addf %197, %198 : vector<8x64xf32>
    %200 = math.tanh %199 : vector<8x64xf32>
    %201 = arith.mulf %195, %200 : vector<8x64xf32>
    %c3_120 = arith.constant 3 : index
    %c0_121 = arith.constant 0 : index
    %c0_122 = arith.constant 0 : index
    %202 = vector.load %arg3[%c3_120, %c0_121, %c0_122] : memref<8x8x1xf32, #tpu.memory_space<vmem>>, vector<1x8x1xf32>
    %203 = vector.shape_cast %202 : vector<1x8x1xf32> to vector<8x1xf32>
    %204 = vector.shape_cast %203 : vector<8x1xf32> to vector<8x1xf32>
    %205 = vector.broadcast %204 : vector<8x1xf32> to vector<8x32xf32>
    %c4_123 = arith.constant 4 : index
    %c0_124 = arith.constant 0 : index
    %c0_125 = arith.constant 0 : index
    %206 = vector.load %arg4[%c4_123, %c0_124, %c0_125] : memref<8x8x1xf32, #tpu.memory_space<vmem>>, vector<1x8x1xf32>
    %207 = vector.shape_cast %206 : vector<1x8x1xf32> to vector<8x1xf32>
    %208 = vector.shape_cast %207 : vector<8x1xf32> to vector<8x1xf32>
    %209 = vector.broadcast %208 : vector<8x1xf32> to vector<8x32xf32>
    %210 = tpu.concatenate %205, %209 in 1 : vector<8x32xf32>, vector<8x32xf32> -> vector<8x64xf32>
    %211 = arith.mulf %210, %199 : vector<8x64xf32>
    %c0_126 = arith.constant 0 : index
    %c0_127 = arith.constant 0 : index
    %212 = vector.load %arg16[%c0_126, %c0_127] : memref<8x64xf32, #tpu.memory_space<vmem>>, vector<8x64xf32>
    tpu.vector_store %arg16[%c0_126, %c0_127], %211 {strides = array<i32>} : memref<8x64xf32, #tpu.memory_space<vmem>>, vector<8x64xf32>,
    %213 = arith.mulf %210, %201 : vector<8x64xf32>
    %c0_128 = arith.constant 0 : index
    %c0_129 = arith.constant 0 : index
    %214 = vector.load %arg15[%c0_128, %c0_129] : memref<8x64xf32, #tpu.memory_space<vmem>>, vector<8x64xf32>
    tpu.vector_store %arg15[%c0_128, %c0_129], %213 {strides = array<i32>} : memref<8x64xf32, #tpu.memory_space<vmem>>, vector<8x64xf32>,
    %215 = vector.extract_strided_slice %213 {offsets = [0, 0], sizes = [8, 32], strides = [1, 1]} : vector<8x64xf32> to vector<8x32xf32>
    %216 = arith.truncf %215 : vector<8x32xf32> to vector<8x32xbf16>
    %c3_130 = arith.constant 3 : index
    %c0_131 = arith.constant 0 : index
    %c0_132 = arith.constant 0 : index
    %217 = vector.load %arg13[%c3_130, %c0_131, %c0_132] : memref<8x8x32xbf16, #tpu.memory_space<vmem>>, vector<1x8x32xbf16>
    %218 = vector.shape_cast %217 : vector<1x8x32xbf16> to vector<8x32xbf16>
    %219 = vector.shape_cast %216 : vector<8x32xbf16> to vector<1x8x32xbf16>
    tpu.vector_store %arg13[%c3_130, %c0_131, %c0_132], %219 {strides = array<i32>} : memref<8x8x32xbf16, #tpu.memory_space<vmem>>, vector<1x8x32xbf16>,
    %220 = vector.extract_strided_slice %213 {offsets = [0, 32], sizes = [8, 32], strides = [1, 1]} : vector<8x64xf32> to vector<8x32xf32>
    %221 = arith.truncf %220 : vector<8x32xf32> to vector<8x32xbf16>
    %c4_133 = arith.constant 4 : index
    %c0_134 = arith.constant 0 : index
    %c0_135 = arith.constant 0 : index
    %222 = vector.load %arg14[%c4_133, %c0_134, %c0_135] : memref<8x8x32xbf16, #tpu.memory_space<vmem>>, vector<1x8x32xbf16>
    %223 = vector.shape_cast %222 : vector<1x8x32xbf16> to vector<8x32xbf16>
    %224 = vector.shape_cast %221 : vector<8x32xbf16> to vector<1x8x32xbf16>
    tpu.vector_store %arg14[%c4_133, %c0_134, %c0_135], %224 {strides = array<i32>} : memref<8x8x32xbf16, #tpu.memory_space<vmem>>, vector<1x8x32xbf16>,
    %c4_136 = arith.constant 4 : index
    %c0_137 = arith.constant 0 : index
    %c0_138 = arith.constant 0 : index
    %225 = vector.load %arg11[%c4_136, %c0_137, %c0_138] : memref<8x8x256xf32, #tpu.memory_space<vmem>>, vector<1x8x256xf32>
    %226 = vector.shape_cast %225 : vector<1x8x256xf32> to vector<8x256xf32>
    %c3_139 = arith.constant 3 : index
    %c0_140 = arith.constant 0 : index
    %c0_141 = arith.constant 0 : index
    %227 = vector.load %arg12[%c3_139, %c0_140, %c0_141] : memref<8x8x256xf32, #tpu.memory_space<vmem>>, vector<1x8x256xf32>
    %228 = vector.shape_cast %227 : vector<1x8x256xf32> to vector<8x256xf32>
    %229 = arith.addf %226, %228 : vector<8x256xf32>
    %c0_142 = arith.constant 0 : index
    %c0_143 = arith.constant 0 : index
    %230 = vector.load %arg15[%c0_142, %c0_143] : memref<8x64xf32, #tpu.memory_space<vmem>>, vector<8x64xf32>
    %231 = arith.truncf %230 : vector<8x64xf32> to vector<8x64xbf16>
    %cst_144 = arith.constant dense<0.000000e+00> : vector<8x256xf32>
    %232 = tpu.matmul %231, %20, %cst_144 {dimension_numbers = #tpu.dot_dimension_numbers<[1], [0], [0], [1], [0, 0, 1, 1], [], []>} : vector<8x64xbf16>, vector<64x256xbf16>, vector<8x256xf32> -> vector<8x256xf32>
    %233 = arith.addf %229, %232 : vector<8x256xf32>
    %234 = arith.negf %233 : vector<8x256xf32>
    %235 = math.exp %234 : vector<8x256xf32>
    %cst_145 = arith.constant 1.000000e+00 : f32
    %236 = vector.broadcast %cst_145 : f32 to vector<8x256xf32>
    %237 = arith.addf %236, %235 : vector<8x256xf32>
    %238 = arith.divf %236, %237 : vector<8x256xf32>
    %239 = vector.extract_strided_slice %238 {offsets = [0, 0], sizes = [8, 64], strides = [1, 1]} : vector<8x256xf32> to vector<8x64xf32>
    %240 = vector.extract_strided_slice %238 {offsets = [0, 64], sizes = [8, 64], strides = [1, 1]} : vector<8x256xf32> to vector<8x64xf32>
    %241 = vector.extract_strided_slice %238 {offsets = [0, 128], sizes = [8, 64], strides = [1, 1]} : vector<8x256xf32> to vector<8x64xf32>
    %cst_146 = arith.constant 2.000000e+00 : f32
    %242 = vector.broadcast %cst_146 : f32 to vector<8x64xf32>
    %243 = arith.mulf %242, %241 : vector<8x64xf32>
    %cst_147 = arith.constant 1.000000e+00 : f32
    %244 = vector.broadcast %cst_147 : f32 to vector<8x64xf32>
    %245 = arith.subf %243, %244 : vector<8x64xf32>
    %246 = vector.extract_strided_slice %238 {offsets = [0, 192], sizes = [8, 64], strides = [1, 1]} : vector<8x256xf32> to vector<8x64xf32>
    %c0_148 = arith.constant 0 : index
    %c0_149 = arith.constant 0 : index
    %247 = vector.load %arg16[%c0_148, %c0_149] : memref<8x64xf32, #tpu.memory_space<vmem>>, vector<8x64xf32>
    %248 = arith.mulf %240, %247 : vector<8x64xf32>
    %249 = arith.mulf %239, %245 : vector<8x64xf32>
    %250 = arith.addf %248, %249 : vector<8x64xf32>
    %251 = math.tanh %250 : vector<8x64xf32>
    %252 = arith.mulf %246, %251 : vector<8x64xf32>
    %c4_150 = arith.constant 4 : index
    %c0_151 = arith.constant 0 : index
    %c0_152 = arith.constant 0 : index
    %253 = vector.load %arg3[%c4_150, %c0_151, %c0_152] : memref<8x8x1xf32, #tpu.memory_space<vmem>>, vector<1x8x1xf32>
    %254 = vector.shape_cast %253 : vector<1x8x1xf32> to vector<8x1xf32>
    %255 = vector.shape_cast %254 : vector<8x1xf32> to vector<8x1xf32>
    %256 = vector.broadcast %255 : vector<8x1xf32> to vector<8x32xf32>
    %c3_153 = arith.constant 3 : index
    %c0_154 = arith.constant 0 : index
    %c0_155 = arith.constant 0 : index
    %257 = vector.load %arg4[%c3_153, %c0_154, %c0_155] : memref<8x8x1xf32, #tpu.memory_space<vmem>>, vector<1x8x1xf32>
    %258 = vector.shape_cast %257 : vector<1x8x1xf32> to vector<8x1xf32>
    %259 = vector.shape_cast %258 : vector<8x1xf32> to vector<8x1xf32>
    %260 = vector.broadcast %259 : vector<8x1xf32> to vector<8x32xf32>
    %261 = tpu.concatenate %256, %260 in 1 : vector<8x32xf32>, vector<8x32xf32> -> vector<8x64xf32>
    %262 = arith.mulf %261, %250 : vector<8x64xf32>
    %c0_156 = arith.constant 0 : index
    %c0_157 = arith.constant 0 : index
    %263 = vector.load %arg16[%c0_156, %c0_157] : memref<8x64xf32, #tpu.memory_space<vmem>>, vector<8x64xf32>
    tpu.vector_store %arg16[%c0_156, %c0_157], %262 {strides = array<i32>} : memref<8x64xf32, #tpu.memory_space<vmem>>, vector<8x64xf32>,
    %264 = arith.mulf %261, %252 : vector<8x64xf32>
    %c0_158 = arith.constant 0 : index
    %c0_159 = arith.constant 0 : index
    %265 = vector.load %arg15[%c0_158, %c0_159] : memref<8x64xf32, #tpu.memory_space<vmem>>, vector<8x64xf32>
    tpu.vector_store %arg15[%c0_158, %c0_159], %264 {strides = array<i32>} : memref<8x64xf32, #tpu.memory_space<vmem>>, vector<8x64xf32>,
    %266 = vector.extract_strided_slice %264 {offsets = [0, 0], sizes = [8, 32], strides = [1, 1]} : vector<8x64xf32> to vector<8x32xf32>
    %267 = arith.truncf %266 : vector<8x32xf32> to vector<8x32xbf16>
    %c4_160 = arith.constant 4 : index
    %c0_161 = arith.constant 0 : index
    %c0_162 = arith.constant 0 : index
    %268 = vector.load %arg13[%c4_160, %c0_161, %c0_162] : memref<8x8x32xbf16, #tpu.memory_space<vmem>>, vector<1x8x32xbf16>
    %269 = vector.shape_cast %268 : vector<1x8x32xbf16> to vector<8x32xbf16>
    %270 = vector.shape_cast %267 : vector<8x32xbf16> to vector<1x8x32xbf16>
    tpu.vector_store %arg13[%c4_160, %c0_161, %c0_162], %270 {strides = array<i32>} : memref<8x8x32xbf16, #tpu.memory_space<vmem>>, vector<1x8x32xbf16>,
    %271 = vector.extract_strided_slice %264 {offsets = [0, 32], sizes = [8, 32], strides = [1, 1]} : vector<8x64xf32> to vector<8x32xf32>
    %272 = arith.truncf %271 : vector<8x32xf32> to vector<8x32xbf16>
    %c3_163 = arith.constant 3 : index
    %c0_164 = arith.constant 0 : index
    %c0_165 = arith.constant 0 : index
    %273 = vector.load %arg14[%c3_163, %c0_164, %c0_165] : memref<8x8x32xbf16, #tpu.memory_space<vmem>>, vector<1x8x32xbf16>
    %274 = vector.shape_cast %273 : vector<1x8x32xbf16> to vector<8x32xbf16>
    %275 = vector.shape_cast %272 : vector<8x32xbf16> to vector<1x8x32xbf16>
    tpu.vector_store %arg14[%c3_163, %c0_164, %c0_165], %275 {strides = array<i32>} : memref<8x8x32xbf16, #tpu.memory_space<vmem>>, vector<1x8x32xbf16>,
    %c5_166 = arith.constant 5 : index
    %c0_167 = arith.constant 0 : index
    %c0_168 = arith.constant 0 : index
    %276 = vector.load %arg11[%c5_166, %c0_167, %c0_168] : memref<8x8x256xf32, #tpu.memory_space<vmem>>, vector<1x8x256xf32>
    %277 = vector.shape_cast %276 : vector<1x8x256xf32> to vector<8x256xf32>
    %c2_169 = arith.constant 2 : index
    %c0_170 = arith.constant 0 : index
    %c0_171 = arith.constant 0 : index
    %278 = vector.load %arg12[%c2_169, %c0_170, %c0_171] : memref<8x8x256xf32, #tpu.memory_space<vmem>>, vector<1x8x256xf32>
    %279 = vector.shape_cast %278 : vector<1x8x256xf32> to vector<8x256xf32>
    %280 = arith.addf %277, %279 : vector<8x256xf32>
    %c0_172 = arith.constant 0 : index
    %c0_173 = arith.constant 0 : index
    %281 = vector.load %arg15[%c0_172, %c0_173] : memref<8x64xf32, #tpu.memory_space<vmem>>, vector<8x64xf32>
    %282 = arith.truncf %281 : vector<8x64xf32> to vector<8x64xbf16>
    %cst_174 = arith.constant dense<0.000000e+00> : vector<8x256xf32>
    %283 = tpu.matmul %282, %20, %cst_174 {dimension_numbers = #tpu.dot_dimension_numbers<[1], [0], [0], [1], [0, 0, 1, 1], [], []>} : vector<8x64xbf16>, vector<64x256xbf16>, vector<8x256xf32> -> vector<8x256xf32>
    %284 = arith.addf %280, %283 : vector<8x256xf32>
    %285 = arith.negf %284 : vector<8x256xf32>
    %286 = math.exp %285 : vector<8x256xf32>
    %cst_175 = arith.constant 1.000000e+00 : f32
    %287 = vector.broadcast %cst_175 : f32 to vector<8x256xf32>
    %288 = arith.addf %287, %286 : vector<8x256xf32>
    %289 = arith.divf %287, %288 : vector<8x256xf32>
    %290 = vector.extract_strided_slice %289 {offsets = [0, 0], sizes = [8, 64], strides = [1, 1]} : vector<8x256xf32> to vector<8x64xf32>
    %291 = vector.extract_strided_slice %289 {offsets = [0, 64], sizes = [8, 64], strides = [1, 1]} : vector<8x256xf32> to vector<8x64xf32>
    %292 = vector.extract_strided_slice %289 {offsets = [0, 128], sizes = [8, 64], strides = [1, 1]} : vector<8x256xf32> to vector<8x64xf32>
    %cst_176 = arith.constant 2.000000e+00 : f32
    %293 = vector.broadcast %cst_176 : f32 to vector<8x64xf32>
    %294 = arith.mulf %293, %292 : vector<8x64xf32>
    %cst_177 = arith.constant 1.000000e+00 : f32
    %295 = vector.broadcast %cst_177 : f32 to vector<8x64xf32>
    %296 = arith.subf %294, %295 : vector<8x64xf32>
    %297 = vector.extract_strided_slice %289 {offsets = [0, 192], sizes = [8, 64], strides = [1, 1]} : vector<8x256xf32> to vector<8x64xf32>
    %c0_178 = arith.constant 0 : index
    %c0_179 = arith.constant 0 : index
    %298 = vector.load %arg16[%c0_178, %c0_179] : memref<8x64xf32, #tpu.memory_space<vmem>>, vector<8x64xf32>
    %299 = arith.mulf %291, %298 : vector<8x64xf32>
    %300 = arith.mulf %290, %296 : vector<8x64xf32>
    %301 = arith.addf %299, %300 : vector<8x64xf32>
    %302 = math.tanh %301 : vector<8x64xf32>
    %303 = arith.mulf %297, %302 : vector<8x64xf32>
    %c5_180 = arith.constant 5 : index
    %c0_181 = arith.constant 0 : index
    %c0_182 = arith.constant 0 : index
    %304 = vector.load %arg3[%c5_180, %c0_181, %c0_182] : memref<8x8x1xf32, #tpu.memory_space<vmem>>, vector<1x8x1xf32>
    %305 = vector.shape_cast %304 : vector<1x8x1xf32> to vector<8x1xf32>
    %306 = vector.shape_cast %305 : vector<8x1xf32> to vector<8x1xf32>
    %307 = vector.broadcast %306 : vector<8x1xf32> to vector<8x32xf32>
    %c2_183 = arith.constant 2 : index
    %c0_184 = arith.constant 0 : index
    %c0_185 = arith.constant 0 : index
    %308 = vector.load %arg4[%c2_183, %c0_184, %c0_185] : memref<8x8x1xf32, #tpu.memory_space<vmem>>, vector<1x8x1xf32>
    %309 = vector.shape_cast %308 : vector<1x8x1xf32> to vector<8x1xf32>
    %310 = vector.shape_cast %309 : vector<8x1xf32> to vector<8x1xf32>
    %311 = vector.broadcast %310 : vector<8x1xf32> to vector<8x32xf32>
    %312 = tpu.concatenate %307, %311 in 1 : vector<8x32xf32>, vector<8x32xf32> -> vector<8x64xf32>
    %313 = arith.mulf %312, %301 : vector<8x64xf32>
    %c0_186 = arith.constant 0 : index
    %c0_187 = arith.constant 0 : index
    %314 = vector.load %arg16[%c0_186, %c0_187] : memref<8x64xf32, #tpu.memory_space<vmem>>, vector<8x64xf32>
    tpu.vector_store %arg16[%c0_186, %c0_187], %313 {strides = array<i32>} : memref<8x64xf32, #tpu.memory_space<vmem>>, vector<8x64xf32>,
    %315 = arith.mulf %312, %303 : vector<8x64xf32>
    %c0_188 = arith.constant 0 : index
    %c0_189 = arith.constant 0 : index
    %316 = vector.load %arg15[%c0_188, %c0_189] : memref<8x64xf32, #tpu.memory_space<vmem>>, vector<8x64xf32>
    tpu.vector_store %arg15[%c0_188, %c0_189], %315 {strides = array<i32>} : memref<8x64xf32, #tpu.memory_space<vmem>>, vector<8x64xf32>,
    %317 = vector.extract_strided_slice %315 {offsets = [0, 0], sizes = [8, 32], strides = [1, 1]} : vector<8x64xf32> to vector<8x32xf32>
    %318 = arith.truncf %317 : vector<8x32xf32> to vector<8x32xbf16>
    %c5_190 = arith.constant 5 : index
    %c0_191 = arith.constant 0 : index
    %c0_192 = arith.constant 0 : index
    %319 = vector.load %arg13[%c5_190, %c0_191, %c0_192] : memref<8x8x32xbf16, #tpu.memory_space<vmem>>, vector<1x8x32xbf16>
    %320 = vector.shape_cast %319 : vector<1x8x32xbf16> to vector<8x32xbf16>
    %321 = vector.shape_cast %318 : vector<8x32xbf16> to vector<1x8x32xbf16>
    tpu.vector_store %arg13[%c5_190, %c0_191, %c0_192], %321 {strides = array<i32>} : memref<8x8x32xbf16, #tpu.memory_space<vmem>>, vector<1x8x32xbf16>,
    %322 = vector.extract_strided_slice %315 {offsets = [0, 32], sizes = [8, 32], strides = [1, 1]} : vector<8x64xf32> to vector<8x32xf32>
    %323 = arith.truncf %322 : vector<8x32xf32> to vector<8x32xbf16>
    %c2_193 = arith.constant 2 : index
    %c0_194 = arith.constant 0 : index
    %c0_195 = arith.constant 0 : index
    %324 = vector.load %arg14[%c2_193, %c0_194, %c0_195] : memref<8x8x32xbf16, #tpu.memory_space<vmem>>, vector<1x8x32xbf16>
    %325 = vector.shape_cast %324 : vector<1x8x32xbf16> to vector<8x32xbf16>
    %326 = vector.shape_cast %323 : vector<8x32xbf16> to vector<1x8x32xbf16>
    tpu.vector_store %arg14[%c2_193, %c0_194, %c0_195], %326 {strides = array<i32>} : memref<8x8x32xbf16, #tpu.memory_space<vmem>>, vector<1x8x32xbf16>,
    %c6_196 = arith.constant 6 : index
    %c0_197 = arith.constant 0 : index
    %c0_198 = arith.constant 0 : index
    %327 = vector.load %arg11[%c6_196, %c0_197, %c0_198] : memref<8x8x256xf32, #tpu.memory_space<vmem>>, vector<1x8x256xf32>
    %328 = vector.shape_cast %327 : vector<1x8x256xf32> to vector<8x256xf32>
    %c1_199 = arith.constant 1 : index
    %c0_200 = arith.constant 0 : index
    %c0_201 = arith.constant 0 : index
    %329 = vector.load %arg12[%c1_199, %c0_200, %c0_201] : memref<8x8x256xf32, #tpu.memory_space<vmem>>, vector<1x8x256xf32>
    %330 = vector.shape_cast %329 : vector<1x8x256xf32> to vector<8x256xf32>
    %331 = arith.addf %328, %330 : vector<8x256xf32>
    %c0_202 = arith.constant 0 : index
    %c0_203 = arith.constant 0 : index
    %332 = vector.load %arg15[%c0_202, %c0_203] : memref<8x64xf32, #tpu.memory_space<vmem>>, vector<8x64xf32>
    %333 = arith.truncf %332 : vector<8x64xf32> to vector<8x64xbf16>
    %cst_204 = arith.constant dense<0.000000e+00> : vector<8x256xf32>
    %334 = tpu.matmul %333, %20, %cst_204 {dimension_numbers = #tpu.dot_dimension_numbers<[1], [0], [0], [1], [0, 0, 1, 1], [], []>} : vector<8x64xbf16>, vector<64x256xbf16>, vector<8x256xf32> -> vector<8x256xf32>
    %335 = arith.addf %331, %334 : vector<8x256xf32>
    %336 = arith.negf %335 : vector<8x256xf32>
    %337 = math.exp %336 : vector<8x256xf32>
    %cst_205 = arith.constant 1.000000e+00 : f32
    %338 = vector.broadcast %cst_205 : f32 to vector<8x256xf32>
    %339 = arith.addf %338, %337 : vector<8x256xf32>
    %340 = arith.divf %338, %339 : vector<8x256xf32>
    %341 = vector.extract_strided_slice %340 {offsets = [0, 0], sizes = [8, 64], strides = [1, 1]} : vector<8x256xf32> to vector<8x64xf32>
    %342 = vector.extract_strided_slice %340 {offsets = [0, 64], sizes = [8, 64], strides = [1, 1]} : vector<8x256xf32> to vector<8x64xf32>
    %343 = vector.extract_strided_slice %340 {offsets = [0, 128], sizes = [8, 64], strides = [1, 1]} : vector<8x256xf32> to vector<8x64xf32>
    %cst_206 = arith.constant 2.000000e+00 : f32
    %344 = vector.broadcast %cst_206 : f32 to vector<8x64xf32>
    %345 = arith.mulf %344, %343 : vector<8x64xf32>
    %cst_207 = arith.constant 1.000000e+00 : f32
    %346 = vector.broadcast %cst_207 : f32 to vector<8x64xf32>
    %347 = arith.subf %345, %346 : vector<8x64xf32>
    %348 = vector.extract_strided_slice %340 {offsets = [0, 192], sizes = [8, 64], strides = [1, 1]} : vector<8x256xf32> to vector<8x64xf32>
    %c0_208 = arith.constant 0 : index
    %c0_209 = arith.constant 0 : index
    %349 = vector.load %arg16[%c0_208, %c0_209] : memref<8x64xf32, #tpu.memory_space<vmem>>, vector<8x64xf32>
    %350 = arith.mulf %342, %349 : vector<8x64xf32>
    %351 = arith.mulf %341, %347 : vector<8x64xf32>
    %352 = arith.addf %350, %351 : vector<8x64xf32>
    %353 = math.tanh %352 : vector<8x64xf32>
    %354 = arith.mulf %348, %353 : vector<8x64xf32>
    %c6_210 = arith.constant 6 : index
    %c0_211 = arith.constant 0 : index
    %c0_212 = arith.constant 0 : index
    %355 = vector.load %arg3[%c6_210, %c0_211, %c0_212] : memref<8x8x1xf32, #tpu.memory_space<vmem>>, vector<1x8x1xf32>
    %356 = vector.shape_cast %355 : vector<1x8x1xf32> to vector<8x1xf32>
    %357 = vector.shape_cast %356 : vector<8x1xf32> to vector<8x1xf32>
    %358 = vector.broadcast %357 : vector<8x1xf32> to vector<8x32xf32>
    %c1_213 = arith.constant 1 : index
    %c0_214 = arith.constant 0 : index
    %c0_215 = arith.constant 0 : index
    %359 = vector.load %arg4[%c1_213, %c0_214, %c0_215] : memref<8x8x1xf32, #tpu.memory_space<vmem>>, vector<1x8x1xf32>
    %360 = vector.shape_cast %359 : vector<1x8x1xf32> to vector<8x1xf32>
    %361 = vector.shape_cast %360 : vector<8x1xf32> to vector<8x1xf32>
    %362 = vector.broadcast %361 : vector<8x1xf32> to vector<8x32xf32>
    %363 = tpu.concatenate %358, %362 in 1 : vector<8x32xf32>, vector<8x32xf32> -> vector<8x64xf32>
    %364 = arith.mulf %363, %352 : vector<8x64xf32>
    %c0_216 = arith.constant 0 : index
    %c0_217 = arith.constant 0 : index
    %365 = vector.load %arg16[%c0_216, %c0_217] : memref<8x64xf32, #tpu.memory_space<vmem>>, vector<8x64xf32>
    tpu.vector_store %arg16[%c0_216, %c0_217], %364 {strides = array<i32>} : memref<8x64xf32, #tpu.memory_space<vmem>>, vector<8x64xf32>,
    %366 = arith.mulf %363, %354 : vector<8x64xf32>
    %c0_218 = arith.constant 0 : index
    %c0_219 = arith.constant 0 : index
    %367 = vector.load %arg15[%c0_218, %c0_219] : memref<8x64xf32, #tpu.memory_space<vmem>>, vector<8x64xf32>
    tpu.vector_store %arg15[%c0_218, %c0_219], %366 {strides = array<i32>} : memref<8x64xf32, #tpu.memory_space<vmem>>, vector<8x64xf32>,
    %368 = vector.extract_strided_slice %366 {offsets = [0, 0], sizes = [8, 32], strides = [1, 1]} : vector<8x64xf32> to vector<8x32xf32>
    %369 = arith.truncf %368 : vector<8x32xf32> to vector<8x32xbf16>
    %c6_220 = arith.constant 6 : index
    %c0_221 = arith.constant 0 : index
    %c0_222 = arith.constant 0 : index
    %370 = vector.load %arg13[%c6_220, %c0_221, %c0_222] : memref<8x8x32xbf16, #tpu.memory_space<vmem>>, vector<1x8x32xbf16>
    %371 = vector.shape_cast %370 : vector<1x8x32xbf16> to vector<8x32xbf16>
    %372 = vector.shape_cast %369 : vector<8x32xbf16> to vector<1x8x32xbf16>
    tpu.vector_store %arg13[%c6_220, %c0_221, %c0_222], %372 {strides = array<i32>} : memref<8x8x32xbf16, #tpu.memory_space<vmem>>, vector<1x8x32xbf16>,
    %373 = vector.extract_strided_slice %366 {offsets = [0, 32], sizes = [8, 32], strides = [1, 1]} : vector<8x64xf32> to vector<8x32xf32>
    %374 = arith.truncf %373 : vector<8x32xf32> to vector<8x32xbf16>
    %c1_223 = arith.constant 1 : index
    %c0_224 = arith.constant 0 : index
    %c0_225 = arith.constant 0 : index
    %375 = vector.load %arg14[%c1_223, %c0_224, %c0_225] : memref<8x8x32xbf16, #tpu.memory_space<vmem>>, vector<1x8x32xbf16>
    %376 = vector.shape_cast %375 : vector<1x8x32xbf16> to vector<8x32xbf16>
    %377 = vector.shape_cast %374 : vector<8x32xbf16> to vector<1x8x32xbf16>
    tpu.vector_store %arg14[%c1_223, %c0_224, %c0_225], %377 {strides = array<i32>} : memref<8x8x32xbf16, #tpu.memory_space<vmem>>, vector<1x8x32xbf16>,
    %c7_226 = arith.constant 7 : index
    %c0_227 = arith.constant 0 : index
    %c0_228 = arith.constant 0 : index
    %378 = vector.load %arg11[%c7_226, %c0_227, %c0_228] : memref<8x8x256xf32, #tpu.memory_space<vmem>>, vector<1x8x256xf32>
    %379 = vector.shape_cast %378 : vector<1x8x256xf32> to vector<8x256xf32>
    %c0_229 = arith.constant 0 : index
    %c0_230 = arith.constant 0 : index
    %c0_231 = arith.constant 0 : index
    %380 = vector.load %arg12[%c0_229, %c0_230, %c0_231] : memref<8x8x256xf32, #tpu.memory_space<vmem>>, vector<1x8x256xf32>
    %381 = vector.shape_cast %380 : vector<1x8x256xf32> to vector<8x256xf32>
    %382 = arith.addf %379, %381 : vector<8x256xf32>
    %c0_232 = arith.constant 0 : index
    %c0_233 = arith.constant 0 : index
    %383 = vector.load %arg15[%c0_232, %c0_233] : memref<8x64xf32, #tpu.memory_space<vmem>>, vector<8x64xf32>
    %384 = arith.truncf %383 : vector<8x64xf32> to vector<8x64xbf16>
    %cst_234 = arith.constant dense<0.000000e+00> : vector<8x256xf32>
    %385 = tpu.matmul %384, %20, %cst_234 {dimension_numbers = #tpu.dot_dimension_numbers<[1], [0], [0], [1], [0, 0, 1, 1], [], []>} : vector<8x64xbf16>, vector<64x256xbf16>, vector<8x256xf32> -> vector<8x256xf32>
    %386 = arith.addf %382, %385 : vector<8x256xf32>
    %387 = arith.negf %386 : vector<8x256xf32>
    %388 = math.exp %387 : vector<8x256xf32>
    %cst_235 = arith.constant 1.000000e+00 : f32
    %389 = vector.broadcast %cst_235 : f32 to vector<8x256xf32>
    %390 = arith.addf %389, %388 : vector<8x256xf32>
    %391 = arith.divf %389, %390 : vector<8x256xf32>
    %392 = vector.extract_strided_slice %391 {offsets = [0, 0], sizes = [8, 64], strides = [1, 1]} : vector<8x256xf32> to vector<8x64xf32>
    %393 = vector.extract_strided_slice %391 {offsets = [0, 64], sizes = [8, 64], strides = [1, 1]} : vector<8x256xf32> to vector<8x64xf32>
    %394 = vector.extract_strided_slice %391 {offsets = [0, 128], sizes = [8, 64], strides = [1, 1]} : vector<8x256xf32> to vector<8x64xf32>
    %cst_236 = arith.constant 2.000000e+00 : f32
    %395 = vector.broadcast %cst_236 : f32 to vector<8x64xf32>
    %396 = arith.mulf %395, %394 : vector<8x64xf32>
    %cst_237 = arith.constant 1.000000e+00 : f32
    %397 = vector.broadcast %cst_237 : f32 to vector<8x64xf32>
    %398 = arith.subf %396, %397 : vector<8x64xf32>
    %399 = vector.extract_strided_slice %391 {offsets = [0, 192], sizes = [8, 64], strides = [1, 1]} : vector<8x256xf32> to vector<8x64xf32>
    %c0_238 = arith.constant 0 : index
    %c0_239 = arith.constant 0 : index
    %400 = vector.load %arg16[%c0_238, %c0_239] : memref<8x64xf32, #tpu.memory_space<vmem>>, vector<8x64xf32>
    %401 = arith.mulf %393, %400 : vector<8x64xf32>
    %402 = arith.mulf %392, %398 : vector<8x64xf32>
    %403 = arith.addf %401, %402 : vector<8x64xf32>
    %404 = math.tanh %403 : vector<8x64xf32>
    %405 = arith.mulf %399, %404 : vector<8x64xf32>
    %c7_240 = arith.constant 7 : index
    %c0_241 = arith.constant 0 : index
    %c0_242 = arith.constant 0 : index
    %406 = vector.load %arg3[%c7_240, %c0_241, %c0_242] : memref<8x8x1xf32, #tpu.memory_space<vmem>>, vector<1x8x1xf32>
    %407 = vector.shape_cast %406 : vector<1x8x1xf32> to vector<8x1xf32>
    %408 = vector.shape_cast %407 : vector<8x1xf32> to vector<8x1xf32>
    %409 = vector.broadcast %408 : vector<8x1xf32> to vector<8x32xf32>
    %c0_243 = arith.constant 0 : index
    %c0_244 = arith.constant 0 : index
    %c0_245 = arith.constant 0 : index
    %410 = vector.load %arg4[%c0_243, %c0_244, %c0_245] : memref<8x8x1xf32, #tpu.memory_space<vmem>>, vector<1x8x1xf32>
    %411 = vector.shape_cast %410 : vector<1x8x1xf32> to vector<8x1xf32>
    %412 = vector.shape_cast %411 : vector<8x1xf32> to vector<8x1xf32>
    %413 = vector.broadcast %412 : vector<8x1xf32> to vector<8x32xf32>
    %414 = tpu.concatenate %409, %413 in 1 : vector<8x32xf32>, vector<8x32xf32> -> vector<8x64xf32>
    %415 = arith.mulf %414, %403 : vector<8x64xf32>
    %c0_246 = arith.constant 0 : index
    %c0_247 = arith.constant 0 : index
    %416 = vector.load %arg16[%c0_246, %c0_247] : memref<8x64xf32, #tpu.memory_space<vmem>>, vector<8x64xf32>
    tpu.vector_store %arg16[%c0_246, %c0_247], %415 {strides = array<i32>} : memref<8x64xf32, #tpu.memory_space<vmem>>, vector<8x64xf32>,
    %417 = arith.mulf %414, %405 : vector<8x64xf32>
    %c0_248 = arith.constant 0 : index
    %c0_249 = arith.constant 0 : index
    %418 = vector.load %arg15[%c0_248, %c0_249] : memref<8x64xf32, #tpu.memory_space<vmem>>, vector<8x64xf32>
    tpu.vector_store %arg15[%c0_248, %c0_249], %417 {strides = array<i32>} : memref<8x64xf32, #tpu.memory_space<vmem>>, vector<8x64xf32>,
    %419 = vector.extract_strided_slice %417 {offsets = [0, 0], sizes = [8, 32], strides = [1, 1]} : vector<8x64xf32> to vector<8x32xf32>
    %420 = arith.truncf %419 : vector<8x32xf32> to vector<8x32xbf16>
    %c7_250 = arith.constant 7 : index
    %c0_251 = arith.constant 0 : index
    %c0_252 = arith.constant 0 : index
    %421 = vector.load %arg13[%c7_250, %c0_251, %c0_252] : memref<8x8x32xbf16, #tpu.memory_space<vmem>>, vector<1x8x32xbf16>
    %422 = vector.shape_cast %421 : vector<1x8x32xbf16> to vector<8x32xbf16>
    %423 = vector.shape_cast %420 : vector<8x32xbf16> to vector<1x8x32xbf16>
    tpu.vector_store %arg13[%c7_250, %c0_251, %c0_252], %423 {strides = array<i32>} : memref<8x8x32xbf16, #tpu.memory_space<vmem>>, vector<1x8x32xbf16>,
    %424 = vector.extract_strided_slice %417 {offsets = [0, 32], sizes = [8, 32], strides = [1, 1]} : vector<8x64xf32> to vector<8x32xf32>
    %425 = arith.truncf %424 : vector<8x32xf32> to vector<8x32xbf16>
    %c0_253 = arith.constant 0 : index
    %c0_254 = arith.constant 0 : index
    %c0_255 = arith.constant 0 : index
    %426 = vector.load %arg14[%c0_253, %c0_254, %c0_255] : memref<8x8x32xbf16, #tpu.memory_space<vmem>>, vector<1x8x32xbf16>
    %427 = vector.shape_cast %426 : vector<1x8x32xbf16> to vector<8x32xbf16>
    %428 = vector.shape_cast %425 : vector<8x32xbf16> to vector<1x8x32xbf16>
    tpu.vector_store %arg14[%c0_253, %c0_254, %c0_255], %428 {strides = array<i32>} : memref<8x8x32xbf16, #tpu.memory_space<vmem>>, vector<1x8x32xbf16>,
    %c0_256 = arith.constant 0 : index
    %c0_257 = arith.constant 0 : index
    %c0_258 = arith.constant 0 : index
    %429 = vector.load %arg13[%c0_256, %c0_257, %c0_258] : memref<8x8x32xbf16, #tpu.memory_space<vmem>>, vector<8x8x32xbf16>
    %430 = vector.shape_cast %429 : vector<8x8x32xbf16> to vector<64x32xbf16>
    %c0_259 = arith.constant 0 : index
    %c0_260 = arith.constant 0 : index
    %c0_261 = arith.constant 0 : index
    %431 = vector.load %arg8[%c0_259, %c0_260, %c0_261] : memref<2x32x8xbf16, #tpu.memory_space<vmem>>, vector<1x32x8xbf16>
    %432 = vector.shape_cast %431 : vector<1x32x8xbf16> to vector<32x8xbf16>
    %cst_262 = arith.constant dense<0.000000e+00> : vector<64x8xf32>
    %433 = tpu.matmul %430, %432, %cst_262 {dimension_numbers = #tpu.dot_dimension_numbers<[1], [0], [0], [1], [0, 0, 1, 1], [], []>} : vector<64x32xbf16>, vector<32x8xbf16>, vector<64x8xf32> -> vector<64x8xf32>
    %c0_263 = arith.constant 0 : index
    %c0_264 = arith.constant 0 : index
    %c0_265 = arith.constant 0 : index
    %434 = vector.load %arg14[%c0_263, %c0_264, %c0_265] : memref<8x8x32xbf16, #tpu.memory_space<vmem>>, vector<8x8x32xbf16>
    %435 = vector.shape_cast %434 : vector<8x8x32xbf16> to vector<64x32xbf16>
    %c1_266 = arith.constant 1 : index
    %c0_267 = arith.constant 0 : index
    %c0_268 = arith.constant 0 : index
    %436 = vector.load %arg8[%c1_266, %c0_267, %c0_268] : memref<2x32x8xbf16, #tpu.memory_space<vmem>>, vector<1x32x8xbf16>
    %437 = vector.shape_cast %436 : vector<1x32x8xbf16> to vector<32x8xbf16>
    %cst_269 = arith.constant dense<0.000000e+00> : vector<64x8xf32>
    %438 = tpu.matmul %435, %437, %cst_269 {dimension_numbers = #tpu.dot_dimension_numbers<[1], [0], [0], [1], [0, 0, 1, 1], [], []>} : vector<64x32xbf16>, vector<32x8xbf16>, vector<64x8xf32> -> vector<64x8xf32>
    %439 = vector.shape_cast %433 : vector<64x8xf32> to vector<8x8x8xf32>
    %c0_270 = arith.constant 0 : index
    %c0_271 = arith.constant 0 : index
    %c0_272 = arith.constant 0 : index
    %440 = vector.load %arg9[%c0_270, %c0_271, %c0_272] : memref<8x8x8xf32, #tpu.memory_space<vmem>>, vector<8x8x8xf32>
    tpu.vector_store %arg9[%c0_270, %c0_271, %c0_272], %439 {strides = array<i32>} : memref<8x8x8xf32, #tpu.memory_space<vmem>>, vector<8x8x8xf32>,
    %441 = vector.shape_cast %438 : vector<64x8xf32> to vector<8x8x8xf32>
    %c0_273 = arith.constant 0 : index
    %c0_274 = arith.constant 0 : index
    %c0_275 = arith.constant 0 : index
    %442 = vector.load %arg10[%c0_273, %c0_274, %c0_275] : memref<8x8x8xf32, #tpu.memory_space<vmem>>, vector<8x8x8xf32>
    tpu.vector_store %arg10[%c0_273, %c0_274, %c0_275], %441 {strides = array<i32>} : memref<8x8x8xf32, #tpu.memory_space<vmem>>, vector<8x8x8xf32>,
    return
  }
  func.func @transform_0(%arg0: i32) -> (i32, i32, i32) {
    %c0_i32 = arith.constant 0 : i32
    %c0_i32_0 = arith.constant 0 : i32
    %c0_i32_1 = arith.constant 0 : i32
    return %arg0, %c0_i32, %c0_i32_0 : i32, i32, i32
  }
  func.func @transform_1(%arg0: i32) -> (i32, i32, i32) {
    %c0_i32 = arith.constant 0 : i32
    %0 = arith.subi %c0_i32, %arg0 : i32
    %c0_i32_0 = arith.constant 0 : i32
    %c0_i32_1 = arith.constant 0 : i32
    %c0_i32_2 = arith.constant 0 : i32
    return %0, %c0_i32_0, %c0_i32_1 : i32, i32, i32
  }
  func.func @transform_2(%arg0: i32) -> (i32, i32, i32) {
    %c0_i32 = arith.constant 0 : i32
    %c0_i32_0 = arith.constant 0 : i32
    %c0_i32_1 = arith.constant 0 : i32
    return %arg0, %c0_i32, %c0_i32_0 : i32, i32, i32
  }
  func.func @transform_3(%arg0: i32) -> (i32, i32, i32) {
    %c0_i32 = arith.constant 0 : i32
    %0 = arith.subi %c0_i32, %arg0 : i32
    %c0_i32_0 = arith.constant 0 : i32
    %c0_i32_1 = arith.constant 0 : i32
    %c0_i32_2 = arith.constant 0 : i32
    return %0, %c0_i32_0, %c0_i32_1 : i32, i32, i32
  }
  func.func @transform_4(%arg0: i32) -> (i32, i32, i32) {
    %c0_i32 = arith.constant 0 : i32
    %c0_i32_0 = arith.constant 0 : i32
    %c0_i32_1 = arith.constant 0 : i32
    %c0_i32_2 = arith.constant 0 : i32
    return %c0_i32, %c0_i32_0, %c0_i32_1 : i32, i32, i32
  }
  func.func @transform_5(%arg0: i32) -> (i32, i32) {
    %c0_i32 = arith.constant 0 : i32
    %c0_i32_0 = arith.constant 0 : i32
    %c0_i32_1 = arith.constant 0 : i32
    return %c0_i32, %c0_i32_0 : i32, i32
  }
  func.func @transform_6(%arg0: i32) -> (i32, i32) {
    %c0_i32 = arith.constant 0 : i32
    %c0_i32_0 = arith.constant 0 : i32
    %c0_i32_1 = arith.constant 0 : i32
    return %c0_i32, %c0_i32_0 : i32, i32
  }
  func.func @transform_7(%arg0: i32) -> (i32, i32, i32) {
    %c0_i32 = arith.constant 0 : i32
    %c0_i32_0 = arith.constant 0 : i32
    %c0_i32_1 = arith.constant 0 : i32
    %c0_i32_2 = arith.constant 0 : i32
    return %c0_i32, %c0_i32_0, %c0_i32_1 : i32, i32, i32
  }
  func.func @transform_8(%arg0: i32) -> (i32, i32, i32) {
    %c0_i32 = arith.constant 0 : i32
    %c0_i32_0 = arith.constant 0 : i32
    %c0_i32_1 = arith.constant 0 : i32
    return %arg0, %c0_i32, %c0_i32_0 : i32, i32, i32
  }
  func.func @transform_9(%arg0: i32) -> (i32, i32, i32) {
    %c0_i32 = arith.constant 0 : i32
    %0 = arith.subi %c0_i32, %arg0 : i32
    %c0_i32_0 = arith.constant 0 : i32
    %c0_i32_1 = arith.constant 0 : i32
    %c0_i32_2 = arith.constant 0 : i32
    return %0, %c0_i32_0, %c0_i32_1 : i32, i32, i32
  }
}

</mosaic_0001>

<bundles_post_ra>
// kernel: bilstm_crf_forward.1
= control target key start
LH: loop header
LB: loop body
LE: loop exit
PB: predicated region body
PF: predicated region fallthrough
CT: control target
= control target key end

     0   :  { %vm94_vm0 = vcmask 523264   ;;  %vm164_vm1 = vcmask 1043456   ;;  %v1991_v2 = vmov 0   ;;  %v1992_v7 = vmov 0.0   ;;  %s1994_s18 = smov 96   ;;  %s2506_s4 = inlined_call_operand.vmem [shape: bf16[2,8,256], index: 4, kind: input, shape index: {}]   ;;  %s2507_s0 = inlined_call_operand.vmem [shape: bf16[8,8,8], index: 0, kind: input, shape index: {}, may-alias: {0,1}]   ;;  %s2508_s1 = inlined_call_operand.vmem [shape: bf16[8,8,8], index: 1, kind: input, shape index: {}, may-alias: {0,1}]   ;;  %s2509_s6 = inlined_call_operand.vmem [shape: bf16[64,256], index: 6, kind: input, shape index: {}]   ;;  %s2510_s2 = inlined_call_operand.vmem [shape: f32[8,8,1], index: 2, kind: input, shape index: {}, may-alias: {2,3}]   ;;  %s2511_s3 = inlined_call_operand.vmem [shape: f32[8,8,1], index: 3, kind: input, shape index: {}, may-alias: {2,3}]   ;;  %s2512_s5 = inlined_call_operand.vmem [shape: f32[1,256], index: 5, kind: input, shape index: {}]   ;;  %s2513_s7 = inlined_call_operand.vmem [shape: bf16[2,32,8], index: 7, kind: input, shape index: {}]   ;;  %s2514_s8 = inlined_call_operand.vmem [shape: f32[8,8,8], index: 8, kind: output, shape index: {0}]   ;;  %s2515_s9 = inlined_call_operand.vmem [shape: f32[8,8,8], index: 9, kind: output, shape index: {1}]  }
   0x1   :  { %v113_v0 = vld [vmem:[%s2506_s4] sm:$0xff]  ;;  %v1727_v1 = vld [vmem:[%s2506_s4 + $0x8] sm:$0xff]  ;;  %203 = vmatprep.mubr.bf16.mxu0 %v1991_v2  ;;  %321 = vmatprep.mubr.bf16.mxu1 %v1991_v2  ;;  %95 = vst.msk [vmem:[#allocation6] sm:$0xff] %vm94_vm0, %v1992_v7  ;;  %96 = vst.msk [vmem:[#allocation7] sm:$0xff] %vm94_vm0, %v1992_v7  ;;  %vm151_vm2 = vcmask 64512   ;;  %s1993_s4 = smov 64   ;;  %v116_v31 = vlaneseq }
   0x2   :  { %v1721_v3 = vcombine.high %v113_v0, %v113_v0  ;;  %v1733_v4 = vcombine.high %v1727_v1, %v1727_v1  ;;  %v1720_v5 = vcombine.low %v113_v0, %v113_v0  ;;  %v1732_v6 = vcombine.low %v1727_v1, %v1727_v1  ;;  %1873 = vset.pattern.permute.xlu1 %v1991_v2  ;;  %v1879_v8 = vld [vmem:[%s2507_s0] sm:$0xff]   ;;  %v2070_v12 = vld [vmem:[%s2509_s6 + $0x34] ss:$8 sps:$4 sm:$0xff]   ;;  %v2075_v13 = vld [vmem:[%s2509_s6 + $0x30] ss:$8 sps:$4 sm:$0xff]  }
   0x3   :  { %1874 = vset.pattern.permute.xlu0 %v1991_v2  ;;  %v1880_v11 = vld [vmem:[%s2508_s1] sm:$0xff]   ;;  %v1884_v16 = vld [vmem:[%s2507_s0 + $0x8] sm:$0xff]   ;;  %v2101_v17 = vld [vmem:[%s2509_s6 + $0x14] ss:$8 sps:$4 sm:$0xff]   ;;  %v117_v32 = vshrl.u32 %v116_v31, 7  ;;  %vm539_vm3 = vcmask 261120  }
   0x4   :  { %1722 = vmatprep.subr.msk.bf16.mxu0 %vm164_vm1, %v1721_v3  ;;  %1734 = vmatprep.subr.msk.bf16.mxu1 %vm164_vm1, %v1733_v4  ;;  %v166_v9 = vsel %vm164_vm1, %v1720_v5, 0  ;;  %v284_v10 = vsel %vm164_vm1, %v1732_v6, 0  ;;  %v2082_v14 = vld [vmem:[%s2509_s6 + $0x24] ss:$8 sps:$4 sm:$0xff]   ;;  %v2091_v15 = vld [vmem:[%s2509_s6 + $0x20] ss:$8 sps:$4 sm:$0xff]  }
   0x5   :  { %186 = vmatpush1.bf16.msra.mxu0 %v166_v9  ;;  %304 = vmatpush1.bf16.msra.mxu1 %v284_v10  ;;  %v1885_v18 = vld [vmem:[%s2508_s1 + $0x8] sm:$0xff]   ;;  %v2113_v19 = vld [vmem:[%s2509_s6 + $0x10] ss:$8 sps:$4 sm:$0xff]   ;;  %v526_v29 = vld [vmem:[%s2510_s2] sm:$0xff]  ;;  %v118_v33 = vsub.s32 0, %v117_v32  ;;  %v122_v37 = vsub.s32 1, %v117_v32 }
   0x6   :  { %463 = vmatprep.subr.bf16.mxu0 %v2070_v12  ;;  %585 = vmatprep.subr.bf16.mxu1 %v2070_v12  ;;  %v2118_v20 = vld [vmem:[%s2509_s6 + $0x4] ss:$8 sps:$4 sm:$0xff]   ;;  %v2129_v22 = vld [vmem:[%s2509_s6] ss:$8 sps:$4 sm:$0xff]   ;;  %v1889_v23 = vld [vmem:[%s2507_s0 + $0x10] sm:$0xff]   ;;  %vm554_vm4 = vcmask 257024  }
   0x7   :  { %v1890_v24 = vld [vmem:[%s2508_s1 + $0x10] sm:$0xff]   ;;  %v1894_v25 = vld [vmem:[%s2507_s0 + $0x18] sm:$0xff]   ;;  %529 = vperm.xlu1 %1873, %v526_v29   ;;  %v114_v34 = vld [vmem:[%s2512_s5] sm:$0x3] }
   0x8   :  { %1723 = vmatmul.mubr.msk.bf16.vlgmr.msra.gmra.mxu0 %vm151_vm2, %v1879_v8  ;;  %1735 = vmatmul.mubr.msk.bf16.vlgmr.msra.gmra.mxu1 %vm151_vm2, %v1880_v11  ;;  %v512_v21 = vld [vmem:[#allocation7] sm:$0xff]  ;;  %v1895_v26 = vld [vmem:[%s2508_s1 + $0x18] sm:$0xff]   ;;  %v409_v27 = vld [vmem:[#allocation6] sm:$0xff]  ;;  %v119_v40 = vrot.slane %v114_v34, %v118_v33  ;;  %v123_v43 = vrot.slane %v114_v34, %v122_v37 }
   0x9   :  { %464 = vmatpush1.bf16.msra.mxu0 %v2075_v13  ;;  %213 = vmatprep.mubr.bf16.mxu0 %v1991_v2  ;;  %v410_v28 = vpack.c.bf16 %v409_v27, %v409_v27  ;;  %v1751_v30 = vld [vmem:[%s2511_s3 + $0x38] sm:$0xff] }
   0xa   :  { %331 = vmatprep.mubr.bf16.mxu1 %v1991_v2  ;;  %465 = vmatprep.subr.bf16.mxu0 %v2082_v14 }
   0xb   :  { %586 = vmatpush1.bf16.msra.mxu1 %v2075_v13  ;;  %514 = vrot.lane.b32.xlu0 %v512_v21, %s1993_s4 }
   0xc   :  { %587 = vmatprep.subr.bf16.mxu1 %v2082_v14  ;;  %536 = vperm.xlu1 %1873, %v1751_v30  }
   0xd   :  { %466 = vmatpush1.bf16.msra.mxu0 %v2091_v15 }
   0xe   :  { %467 = vmatprep.subr.bf16.mxu0 %v2101_v17 }
   0xf   :  { %588 = vmatpush1.bf16.msra.mxu1 %v2091_v15 }
  0x10   :  { %1724 = vmatmul.mubr.msk.bf16.gmra.mxu0 %vm151_vm2, %v1884_v16  ;;  %1736 = vmatmul.mubr.msk.bf16.gmra.mxu1 %vm151_vm2, %v1885_v18 }
  0x11   :  { %223 = vmatprep.mubr.bf16.mxu0 %v1991_v2  ;;  %341 = vmatprep.mubr.bf16.mxu1 %v1991_v2 }
  0x12   :  { %468 = vmatpush1.bf16.msra.mxu0 %v2113_v19  ;;  %589 = vmatprep.subr.bf16.mxu1 %v2101_v17 }
  0x13   :  { %469 = vmatprep.subr.bf16.mxu0 %v2118_v20  ;;  %590 = vmatpush1.bf16.msra.mxu1 %v2113_v19 }
  0x14   :  { %591 = vmatprep.subr.bf16.mxu1 %v2118_v20 }
  0x16   :  { %470 = vmatpush1.bf16.msra.mxu0 %v2129_v22 }
  0x17   :  { %707 = vmatprep.subr.bf16.mxu0 %v2070_v12  ;;  %592 = vmatpush1.bf16.msra.mxu1 %v2129_v22 }
  0x18   :  { %1725 = vmatmul.mubr.msk.bf16.gmra.mxu0 %vm151_vm2, %v1889_v23  ;;  %1737 = vmatmul.mubr.msk.bf16.gmra.mxu1 %vm151_vm2, %v1890_v24 }
  0x19   :  { %233 = vmatprep.mubr.bf16.mxu0 %v1991_v2  ;;  %351 = vmatprep.mubr.bf16.mxu1 %v1991_v2 }
  0x1a   :  { %829 = vmatprep.subr.bf16.mxu1 %v2070_v12 }
  0x20   :  { %1726 = vmatmul.mubr.msk.bf16.gmra.mxu0 %vm151_vm2, %v1894_v25  ;;  %1738 = vmatmul.mubr.msk.bf16.gmra.mxu1 %vm151_vm2, %v1895_v26 }
  0x21   :  { %487 = vmatprep.mubr.bf16.mxu0 %v1991_v2  ;;  %609 = vmatprep.mubr.bf16.mxu1 %v1991_v2 }
  0x28   :  { %1747 = vmatmul.mubr.msk.bf16.vlgmr.msra.gmra.mxu0 %vm94_vm0, %v410_v28 }
  0x29   :  { %708 = vmatpush1.bf16.msra.mxu0 %v2075_v13  ;;  %731 = vmatprep.mubr.bf16.mxu0 %v1991_v2 }
  0x2a   :  { %709 = vmatprep.subr.bf16.mxu0 %v2082_v14 }
  0x2d   :  { %710 = vmatpush1.bf16.msra.mxu0 %v2091_v15 }
  0x2e   :  { %711 = vmatprep.subr.bf16.mxu0 %v2101_v17 }
  0x31   :  { %712 = vmatpush1.bf16.msra.mxu0 %v2113_v19 }
  0x32   :  { %713 = vmatprep.subr.bf16.mxu0 %v2118_v20 }
  0x35   :  { %714 = vmatpush1.bf16.msra.mxu0 %v2129_v22 }
  0x36   :  { %951 = vmatprep.subr.bf16.mxu0 %v2070_v12 }
  0xc8   :  { %v205_v35 = vpop.f32.mrf.mxu0  ;;  %v2179_v36 = vpop.f32.mrf.mxu1 }
  0xca   :  { %v207_v38 = vpop.f32.mrf.mxu0  ;;  %v2181_v39 = vpop.f32.mrf.mxu1 }
  0xcc   :  { %v209_v41 = vpop.f32.mrf.mxu0  ;;  %v327_v42 = vpop.f32.mrf.mxu1 }
  0xcd   :  { %v210_v44 = vadd.f32 %v209_v41, %v119_v40  ;;  %v206_v41 = vadd.f32 %v205_v35, %v119_v40 }
  0xce   :  { %v211_v45 = vpop.f32.mrf.mxu0  ;;  %v329_v46 = vpop.f32.mrf.mxu1 }
  0xcf   :  { %v212_v47 = vadd.f32 %v211_v45, %v123_v43 }
  0xd0   :  { %v215_v48 = vpop.f32.mrf.mxu0  ;;  %v333_v49 = vpop.f32.mrf.mxu1 }
  0xd1   :  { %v216_v50 = vadd.f32 %v215_v48, %v119_v40 }
  0xd2   :  { %v217_v51 = vpop.f32.mrf.mxu0  ;;  %v335_v52 = vpop.f32.mrf.mxu1 }
  0xd3   :  { %v218_v53 = vadd.f32 %v217_v51, %v123_v43  ;;  %v208_v51 = vadd.f32 %v207_v38, %v123_v43 }
  0xd4   :  { %v219_v54 = vpop.f32.mrf.mxu0  ;;  %v337_v55 = vpop.f32.mrf.mxu1 }
  0xd5   :  { %v220_v56 = vadd.f32 %v219_v54, %v119_v40 }
  0xd6   :  { %v221_v57 = vpop.f32.mrf.mxu0  ;;  %v339_v58 = vpop.f32.mrf.mxu1 }
  0xd7   :  { %v222_v59 = vadd.f32 %v221_v57, %v123_v43 }
  0xd8   :  { %v225_v60 = vpop.f32.mrf.mxu0  ;;  %v343_v61 = vpop.f32.mrf.mxu1 }
  0xd9   :  { %v226_v62 = vadd.f32 %v225_v60, %v119_v40  ;;  %v2183_v63 = vadd.f32 %v343_v61, %v220_v56 }
  0xda   :  { %v227_v0 = vpop.f32.mrf.mxu0  ;;  %v345_v1 = vpop.f32.mrf.mxu1 }
  0xdb   :  { %v228_v3 = vadd.f32 %v227_v0, %v123_v43  ;;  %v2185_v4 = vadd.f32 %v345_v1, %v222_v59  ;;  %v2187_v5 = vadd.f32 %v337_v55, %v226_v62  ;;  %v515_v1 = vpop.permute.xlu0 %514 }
  0xdc   :  { %v229_v6 = vpop.f32.mrf.mxu0  ;;  %v347_v7 = vpop.f32.mrf.mxu1 }
  0xdd   :  { %v230_v8 = vadd.f32 %v229_v6, %v119_v40  ;;  %v2189_v9 = vadd.f32 %v347_v7, %v216_v50  ;;  %v2191_v10 = vadd.f32 %v339_v58, %v228_v3 }
  0xde   :  { %v231_v11 = vpop.f32.mrf.mxu0  ;;  %v349_v16 = vpop.f32.mrf.mxu1 }
  0xdf   :  { %v232_v18 = vadd.f32 %v231_v11, %v123_v43  ;;  %v2193_v21 = vadd.f32 %v349_v16, %v218_v53  ;;  %v2195_v23 = vadd.f32 %v333_v49, %v230_v8  ;;  %v530_v16 = vpop.permute.xlu1 %529 }
  0xe0   :  { %v235_v24 = vpop.f32.mrf.mxu0  ;;  %v353_v25 = vpop.f32.mrf.mxu1 }
  0xe1   :  { %v236_v26 = vadd.f32 %v235_v24, %v119_v40  ;;  %v2197_v27 = vadd.f32 %v353_v25, %v210_v44  ;;  %v2199_v28 = vadd.f32 %v335_v52, %v232_v18 }
  0xe2   :  { %v237_v29 = vpop.f32.mrf.mxu0  ;;  %v355_v30 = vpop.f32.mrf.mxu1 }
  0xe3   :  { %v238_v31 = vadd.f32 %v237_v29, %v123_v43  ;;  %v2201_v32 = vadd.f32 %v355_v30, %v212_v47  ;;  %v2203_v33 = vadd.f32 %v327_v42, %v236_v26  ;;  %v537_v18 = vpop.permute.xlu1 %536 }
  0xe4   :  { %v239_v34 = vpop.f32.mrf.mxu0  ;;  %v357_v37 = vpop.f32.mrf.mxu1  ;;  %v540_v24 = vsel %vm539_vm3, %v530_v16, %v537_v18 }
  0xe5   :  { %v240_v45 = vadd.f32 %v239_v34, %v119_v40  ;;  %v2205_v48 = vadd.f32 %v329_v46, %v238_v31  ;;  %v407_v44 = vadd.f32 %v357_v37, %v206_v41 }
  0xe6   :  { %v241_v49 = vpop.f32.mrf.mxu0  ;;  %v359_v50 = vpop.f32.mrf.mxu1 }
  0xe7   :  { %v242_v53 = vadd.f32 %v241_v49, %v123_v43  ;;  %v2208_v52 = vadd.f32 %v2179_v36, %v240_v45  ;;  %v408_v55 = vadd.f32 %v359_v50, %v208_v51  ;;  %v1757_v45 = vld [vmem:[%s2510_s2 + $0x8] sm:$0xff] }
  0xe8   :  { %v489_v54 = vpop.f32.mrf.mxu0 }
  0xe9   :  { %v496_v47 = vadd.f32 %v489_v54, %v407_v44  ;;  %v2211_v42 = vadd.f32 %v2181_v39, %v242_v53 }
  0xea   :  { %v491_v56 = vpop.f32.mrf.mxu0 }
  0xeb   :  { %v1748_v57 = vmul.f32 -1.442695, %v496_v47  ;;  %v497_v35 = vadd.f32 %v491_v56, %v408_v55 }
  0xec   :  { %v493_v40 = vpop.f32.mrf.mxu0 }
  0xed   :  { %v1749_v46 = vmul.f32 -1.442695, %v497_v35  ;;  %1911 = vpow2.f32 %v1748_v57 }
  0xee   :  { %v494_v58 = vpop.f32.mrf.mxu0 }
  0xef   :  { %1913 = vpow2.f32 %v1749_v46 }
  0xfa   :  { %v1912_v38 = vpop.eup %1911 }
  0xfb   :  { %v504_v60 = vadd.f32 1.0, %v1912_v38 }
  0xfc   :  { %v1914_v59 = vpop.eup %1913 }
  0xfd   :  { %v505_v43 = vadd.f32 1.0, %v1914_v59 }
  0xff   :  { %1915 = vrcp.f32 %v505_v43 }
 0x100   :  { %1917 = vrcp.f32 %v504_v60 }
 0x10c   :  { %v1916_v36 = vpop.eup %1915 }
 0x10d   :  { %v510_v61 = vmul.f32 2.0, %v1916_v36  ;;  %v1918_v0 = vpop.eup %1917 }
 0x10e   :  { %v517_v3 = vmul.f32 %v1918_v0, %v515_v1 }
 0x10f   :  { %v1750_v62 = vadd.f32 -1.0, %v510_v61 }
 0x111   :  { %v518_v39 = vmul.f32 %v1918_v0, %v1750_v62 }
 0x113   :  { %520 = vrot.lane.b32.xlu0 %v518_v39, %s1993_s4 }
 0x185   :  { %v521_v6 = vpop.permute.xlu0 %520 }
 0x186   :  { %v523_v7 = vadd.f32 %v521_v6, %v517_v3 }
 0x188   :  { %1919 = vtanh.f32 %v523_v7  ;;  %542 = vrot.lane.b32.xlu1 %v523_v7, %s1993_s4 }
 0x195   :  { %v1920_v8 = vpop.eup %1919 }
 0x196   :  { %v525_v11 = vmul.f32 %v1920_v8, %v1916_v36 }
 0x198   :  { %548 = vrot.lane.b32.xlu0 %v525_v11, %s1993_s4  ;;  %v1764_v11 = vld [vmem:[%s2510_s2 + $0x10] sm:$0xff] }
 0x1fa   :  { %v543_v25 = vpop.permute.xlu1 %542 }
 0x1fb   :  { %v545_v26 = vmul.f32 %v543_v25, %v540_v24 }
 0x1fd   :  { %546 = vst.msk [vmem:[#allocation7] sm:$0xff] %vm94_vm0, %v545_v26 }
 0x204   :  { %v634_v29 = vld [vmem:[#allocation7] sm:$0xff] }
 0x205   :  { %636 = vrot.lane.b32.xlu0 %v634_v29, %s1993_s4 }
 0x209   :  { %652 = vperm.xlu0 %1874, %v1757_v45  }
 0x20a   :  { %v549_v30 = vpop.permute.xlu0 %548 }
 0x20b   :  { %v551_v31 = vmul.f32 %v549_v30, %v540_v24 }
 0x20d   :  { %552 = vst.msk [vmem:[#allocation6] sm:$0xff] %vm94_vm0, %v551_v31  ;;  %v2220_v34 = vpack.c.bf16 %v551_v31, %v551_v31 }
 0x20f   :  { %555 = vst.msk [vmem:[#allocation4] sm:$0xf] %vm554_vm4, %v2220_v34 }
 0x214   :  { %v572_v37 = vld [vmem:[#allocation6] sm:$0xff] }
 0x215   :  { %v573_v41 = vpack.c.bf16 %v572_v37, %v572_v37 }
 0x217   :  { %1753 = vmatmul.mubr.msk.bf16.vlgmr.msra.gmra.mxu1 %vm94_vm0, %v573_v41 }
 0x218   :  { %830 = vmatpush1.bf16.msra.mxu1 %v2075_v13  ;;  %853 = vmatprep.mubr.bf16.mxu1 %v1991_v2 }
 0x219   :  { %831 = vmatprep.subr.bf16.mxu1 %v2082_v14 }
 0x21c   :  { %832 = vmatpush1.bf16.msra.mxu1 %v2091_v15 }
 0x21d   :  { %833 = vmatprep.subr.bf16.mxu1 %v2101_v17 }
 0x220   :  { %834 = vmatpush1.bf16.msra.mxu1 %v2113_v19 }
 0x221   :  { %835 = vmatprep.subr.bf16.mxu1 %v2118_v20 }
 0x224   :  { %836 = vmatpush1.bf16.msra.mxu1 %v2129_v22 }
 0x225   :  { %1073 = vmatprep.subr.bf16.mxu1 %v2070_v12 }
 0x277   :  { %v637_v43 = vpop.permute.xlu0 %636 }
 0x284   :  { %v653_v39 = vpop.permute.xlu0 %652 }
 0x2d7   :  { %v611_v49 = vpop.f32.mrf.mxu1 }
 0x2d8   :  { %v618_v50 = vadd.f32 %v611_v49, %v2197_v27 }
 0x2d9   :  { %v613_v51 = vpop.f32.mrf.mxu1 }
 0x2da   :  { %v1754_v44 = vmul.f32 -1.442695, %v618_v50  ;;  %v619_v53 = vadd.f32 %v613_v51, %v2201_v32  ;;  %v1758_v32 = vld [vmem:[%s2511_s3 + $0x30] sm:$0xff] }
 0x2db   :  { %v615_v54 = vpop.f32.mrf.mxu1 }
 0x2dc   :  { %v1755_v55 = vmul.f32 -1.442695, %v619_v53  ;;  %1921 = vpow2.f32 %v1754_v44 }
 0x2dd   :  { %v616_v47 = vpop.f32.mrf.mxu1 }
 0x2de   :  { %1923 = vpow2.f32 %v1755_v55 }
 0x2e9   :  { %v1922_v56 = vpop.eup %1921 }
 0x2ea   :  { %v626_v40 = vadd.f32 1.0, %v1922_v56 }
 0x2eb   :  { %v1924_v57 = vpop.eup %1923 }
 0x2ec   :  { %v627_v35 = vadd.f32 1.0, %v1924_v57 }
 0x2ee   :  { %1925 = vrcp.f32 %v627_v35 }
 0x2ef   :  { %1927 = vrcp.f32 %v626_v40 }
 0x2fb   :  { %v1926_v46 = vpop.eup %1925 }
 0x2fc   :  { %v632_v58 = vmul.f32 2.0, %v1926_v46  ;;  %v1928_v59 = vpop.eup %1927 }
 0x2fd   :  { %v639_v60 = vmul.f32 %v1928_v59, %v637_v43 }
 0x2fe   :  { %v1756_v38 = vadd.f32 -1.0, %v632_v58 }
 0x300   :  { %v640_v27 = vmul.f32 %v1928_v59, %v1756_v38 }
 0x302   :  { %642 = vrot.lane.b32.xlu1 %v640_v27, %s1993_s4 }
 0x306   :  { %659 = vperm.xlu1 %1873, %v1758_v32  }
 0x374   :  { %v643_v36 = vpop.permute.xlu1 %642 }
 0x375   :  { %v645_v61 = vadd.f32 %v643_v36, %v639_v60 }
 0x377   :  { %1929 = vtanh.f32 %v645_v61  ;;  %664 = vrot.lane.b32.xlu0 %v645_v61, %s1993_s4 }
 0x381   :  { %v660_v1 = vpop.permute.xlu1 %659 }
 0x382   :  { %v662_v3 = vsel %vm539_vm3, %v653_v39, %v660_v1 }
 0x384   :  { %v1930_v62 = vpop.eup %1929 }
 0x385   :  { %v647_v0 = vmul.f32 %v1930_v62, %v1926_v46  ;;  %v1771_v62 = vld [vmem:[%s2510_s2 + $0x18] sm:$0xff] }
 0x387   :  { %670 = vrot.lane.b32.xlu1 %v647_v0, %s1993_s4 }
 0x3e9   :  { %v665_v6 = vpop.permute.xlu0 %664 }
 0x3ea   :  { %v667_v7 = vmul.f32 %v665_v6, %v662_v3 }
 0x3ec   :  { %668 = vst.msk [vmem:[#allocation7] sm:$0xff] %vm94_vm0, %v667_v7 }
 0x3f3   :  { %v756_v8 = vld [vmem:[#allocation7] sm:$0xff] }
 0x3f4   :  { %758 = vrot.lane.b32.xlu1 %v756_v8, %s1993_s4 }
 0x3f8   :  { %774 = vperm.xlu1 %1873, %v1764_v11  }
 0x3f9   :  { %v671_v16 = vpop.permute.xlu1 %670 }
 0x3fa   :  { %v673_v18 = vmul.f32 %v671_v16, %v662_v3 }
 0x3fc   :  { %674 = vst.msk [vmem:[#allocation6] sm:$0xff] %vm94_vm0, %v673_v18  ;;  %v2252_v24 = vpack.c.bf16 %v673_v18, %v673_v18 }
 0x3fe   :  { %677 = vst.msk [vmem:[#allocation4 + $0x4] sm:$0xf] %vm554_vm4, %v2252_v24 }
 0x403   :  { %v694_v25 = vld [vmem:[#allocation6] sm:$0xff] }
 0x404   :  { %v695_v26 = vpack.c.bf16 %v694_v25, %v694_v25 }
 0x406   :  { %1760 = vmatmul.mubr.msk.bf16.vlgmr.msra.gmra.mxu0 %vm94_vm0, %v695_v26 }
 0x407   :  { %952 = vmatpush1.bf16.msra.mxu0 %v2075_v13  ;;  %975 = vmatprep.mubr.bf16.mxu0 %v1991_v2 }
 0x408   :  { %953 = vmatprep.subr.bf16.mxu0 %v2082_v14 }
 0x40b   :  { %954 = vmatpush1.bf16.msra.mxu0 %v2091_v15 }
 0x40c   :  { %955 = vmatprep.subr.bf16.mxu0 %v2101_v17 }
 0x40f   :  { %956 = vmatpush1.bf16.msra.mxu0 %v2113_v19 }
 0x410   :  { %957 = vmatprep.subr.bf16.mxu0 %v2118_v20 }
 0x413   :  { %958 = vmatpush1.bf16.msra.mxu0 %v2129_v22 }
 0x414   :  { %1195 = vmatprep.subr.bf16.mxu0 %v2070_v12 }
 0x466   :  { %v759_v35 = vpop.permute.xlu1 %758 }
 0x473   :  { %v775_v32 = vpop.permute.xlu1 %774 }
 0x4c6   :  { %v733_v29 = vpop.f32.mrf.mxu0 }
 0x4c7   :  { %v740_v30 = vadd.f32 %v733_v29, %v2189_v9 }
 0x4c8   :  { %v735_v31 = vpop.f32.mrf.mxu0 }
 0x4c9   :  { %v1761_v37 = vmul.f32 -1.442695, %v740_v30  ;;  %v741_v41 = vadd.f32 %v735_v31, %v2193_v21  ;;  %v1765_v21 = vld [vmem:[%s2511_s3 + $0x28] sm:$0xff] }
 0x4ca   :  { %v737_v45 = vpop.f32.mrf.mxu0 }
 0x4cb   :  { %v1762_v49 = vmul.f32 -1.442695, %v741_v41  ;;  %1931 = vpow2.f32 %v1761_v37 }
 0x4cc   :  { %v738_v50 = vpop.f32.mrf.mxu0 }
 0x4cd   :  { %1933 = vpow2.f32 %v1762_v49 }
 0x4d8   :  { %v1932_v51 = vpop.eup %1931 }
 0x4d9   :  { %v748_v54 = vadd.f32 1.0, %v1932_v51 }
 0x4da   :  { %v1934_v44 = vpop.eup %1933 }
 0x4db   :  { %v749_v53 = vadd.f32 1.0, %v1934_v44 }
 0x4dd   :  { %1935 = vrcp.f32 %v749_v53 }
 0x4de   :  { %1937 = vrcp.f32 %v748_v54 }
 0x4ea   :  { %v1936_v55 = vpop.eup %1935 }
 0x4eb   :  { %v754_v47 = vmul.f32 2.0, %v1936_v55  ;;  %v1938_v57 = vpop.eup %1937 }
 0x4ec   :  { %v761_v40 = vmul.f32 %v1938_v57, %v759_v35 }
 0x4ed   :  { %v1763_v56 = vadd.f32 -1.0, %v754_v47 }
 0x4ef   :  { %v762_v9 = vmul.f32 %v1938_v57, %v1763_v56 }
 0x4f1   :  { %764 = vrot.lane.b32.xlu0 %v762_v9, %s1993_s4 }
 0x4f5   :  { %781 = vperm.xlu0 %1874, %v1765_v21  }
 0x563   :  { %v765_v46 = vpop.permute.xlu0 %764 }
 0x564   :  { %v767_v58 = vadd.f32 %v765_v46, %v761_v40  ;;  %v1778_v46 = vld [vmem:[%s2510_s2 + $0x20] sm:$0xff] }
 0x566   :  { %1939 = vtanh.f32 %v767_v58  ;;  %786 = vrot.lane.b32.xlu0 %v767_v58, %s1993_s4 }
 0x570   :  { %v782_v27 = vpop.permute.xlu0 %781 }
 0x571   :  { %v784_v43 = vsel %vm539_vm3, %v775_v32, %v782_v27 }
 0x573   :  { %v1940_v38 = vpop.eup %1939 }
 0x574   :  { %v769_v59 = vmul.f32 %v1940_v38, %v1936_v55 }
 0x576   :  { %792 = vrot.lane.b32.xlu1 %v769_v59, %s1993_s4 }
 0x5d8   :  { %v787_v60 = vpop.permute.xlu0 %786 }
 0x5d9   :  { %v789_v36 = vmul.f32 %v787_v60, %v784_v43 }
 0x5db   :  { %790 = vst.msk [vmem:[#allocation7] sm:$0xff] %vm94_vm0, %v789_v36 }
 0x5e2   :  { %v878_v61 = vld [vmem:[#allocation7] sm:$0xff] }
 0x5e3   :  { %880 = vrot.lane.b32.xlu1 %v878_v61, %s1993_s4 }
 0x5e7   :  { %896 = vperm.xlu1 %1873, %v1771_v62  }
 0x5e8   :  { %v793_v0 = vpop.permute.xlu1 %792 }
 0x5e9   :  { %v795_v39 = vmul.f32 %v793_v0, %v784_v43 }
 0x5eb   :  { %796 = vst.msk [vmem:[#allocation6] sm:$0xff] %vm94_vm0, %v795_v39  ;;  %v2281_v1 = vpack.c.bf16 %v795_v39, %v795_v39 }
 0x5ed   :  { %799 = vst.msk [vmem:[#allocation4 + $0x8] sm:$0xf] %vm554_vm4, %v2281_v1 }
 0x5f2   :  { %v816_v3 = vld [vmem:[#allocation6] sm:$0xff] }
 0x5f3   :  { %v817_v6 = vpack.c.bf16 %v816_v3, %v816_v3 }
 0x5f5   :  { %1767 = vmatmul.mubr.msk.bf16.vlgmr.msra.gmra.mxu1 %vm94_vm0, %v817_v6 }
 0x5f6   :  { %1074 = vmatpush1.bf16.msra.mxu1 %v2075_v13  ;;  %1097 = vmatprep.mubr.bf16.mxu1 %v1991_v2 }
 0x5f7   :  { %1075 = vmatprep.subr.bf16.mxu1 %v2082_v14 }
 0x5fa   :  { %1076 = vmatpush1.bf16.msra.mxu1 %v2091_v15 }
 0x5fb   :  { %1077 = vmatprep.subr.bf16.mxu1 %v2101_v17 }
 0x5fe   :  { %1078 = vmatpush1.bf16.msra.mxu1 %v2113_v19 }
 0x5ff   :  { %1079 = vmatprep.subr.bf16.mxu1 %v2118_v20 }
 0x602   :  { %1080 = vmatpush1.bf16.msra.mxu1 %v2129_v22 }
 0x603   :  { %1316 = vmatprep.subr.bf16.mxu1 %v2070_v12 }
 0x655   :  { %v881_v51 = vpop.permute.xlu1 %880 }
 0x662   :  { %v897_v57 = vpop.permute.xlu1 %896 }
 0x6b5   :  { %v855_v7 = vpop.f32.mrf.mxu1 }
 0x6b6   :  { %v862_v8 = vadd.f32 %v855_v7, %v2183_v63 }
 0x6b7   :  { %v857_v11 = vpop.f32.mrf.mxu1 }
 0x6b8   :  { %v1768_v16 = vmul.f32 -1.442695, %v862_v8  ;;  %v863_v18 = vadd.f32 %v857_v11, %v2185_v4  ;;  %v1772_v4 = vld [vmem:[%s2511_s3 + $0x20] sm:$0xff] }
 0x6b9   :  { %v859_v25 = vpop.f32.mrf.mxu1 }
 0x6ba   :  { %v1769_v26 = vmul.f32 -1.442695, %v863_v18  ;;  %1941 = vpow2.f32 %v1768_v16 }
 0x6bb   :  { %v860_v29 = vpop.f32.mrf.mxu1 }
 0x6bc   :  { %1943 = vpow2.f32 %v1769_v26 }
 0x6c7   :  { %v1942_v30 = vpop.eup %1941 }
 0x6c8   :  { %v870_v41 = vadd.f32 1.0, %v1942_v30 }
 0x6c9   :  { %v1944_v31 = vpop.eup %1943 }
 0x6ca   :  { %v871_v37 = vadd.f32 1.0, %v1944_v31 }
 0x6cc   :  { %1945 = vrcp.f32 %v871_v37 }
 0x6cd   :  { %1947 = vrcp.f32 %v870_v41 }
 0x6d9   :  { %v1946_v45 = vpop.eup %1945 }
 0x6da   :  { %v876_v12 = vmul.f32 2.0, %v1946_v45  ;;  %v1948_v50 = vpop.eup %1947 }
 0x6db   :  { %v883_v44 = vmul.f32 %v1948_v50, %v881_v51 }
 0x6dc   :  { %v1770_v49 = vadd.f32 -1.0, %v876_v12 }
 0x6de   :  { %v884_v63 = vmul.f32 %v1948_v50, %v1770_v49 }
 0x6e0   :  { %886 = vrot.lane.b32.xlu0 %v884_v63, %s1993_s4 }
 0x6e4   :  { %903 = vperm.xlu0 %1874, %v1772_v4  }
 0x752   :  { %v887_v53 = vpop.permute.xlu0 %886 }
 0x753   :  { %v889_v54 = vadd.f32 %v887_v53, %v883_v44  ;;  %v1785_v44 = vld [vmem:[%s2510_s2 + $0x28] sm:$0xff] }
 0x755   :  { %1949 = vtanh.f32 %v889_v54  ;;  %908 = vrot.lane.b32.xlu0 %v889_v54, %s1993_s4 }
 0x75f   :  { %v904_v56 = vpop.permute.xlu0 %903 }
 0x760   :  { %v906_v9 = vsel %vm539_vm3, %v897_v57, %v904_v56 }
 0x762   :  { %v1950_v55 = vpop.eup %1949 }
 0x763   :  { %v891_v47 = vmul.f32 %v1950_v55, %v1946_v45 }
 0x765   :  { %914 = vrot.lane.b32.xlu1 %v891_v47, %s1993_s4 }
 0x7c7   :  { %v909_v21 = vpop.permute.xlu0 %908 }
 0x7c8   :  { %v911_v35 = vmul.f32 %v909_v21, %v906_v9 }
 0x7ca   :  { %912 = vst.msk [vmem:[#allocation7] sm:$0xff] %vm94_vm0, %v911_v35 }
 0x7d1   :  { %v1000_v40 = vld [vmem:[#allocation7] sm:$0xff] }
 0x7d2   :  { %1002 = vrot.lane.b32.xlu1 %v1000_v40, %s1993_s4 }
 0x7d6   :  { %1018 = vperm.xlu1 %1873, %v1778_v46  }
 0x7d7   :  { %v915_v58 = vpop.permute.xlu1 %914 }
 0x7d8   :  { %v917_v38 = vmul.f32 %v915_v58, %v906_v9 }
 0x7da   :  { %918 = vst.msk [vmem:[#allocation6] sm:$0xff] %vm94_vm0, %v917_v38  ;;  %v2310_v59 = vpack.c.bf16 %v917_v38, %v917_v38 }
 0x7dc   :  { %921 = vst.msk [vmem:[#allocation4 + $0xc] sm:$0xf] %vm554_vm4, %v2310_v59 }
 0x7e1   :  { %v938_v27 = vld [vmem:[#allocation6] sm:$0xff] }
 0x7e2   :  { %v939_v32 = vpack.c.bf16 %v938_v27, %v938_v27 }
 0x7e4   :  { %1774 = vmatmul.mubr.msk.bf16.vlgmr.msra.gmra.mxu0 %vm94_vm0, %v939_v32 }
 0x7e5   :  { %1196 = vmatpush1.bf16.msra.mxu0 %v2075_v13  ;;  %1219 = vmatprep.mubr.bf16.mxu0 %v1991_v2 }
 0x7e6   :  { %1197 = vmatprep.subr.bf16.mxu0 %v2082_v14 }
 0x7e9   :  { %1198 = vmatpush1.bf16.msra.mxu0 %v2091_v15 }
 0x7ea   :  { %1199 = vmatprep.subr.bf16.mxu0 %v2101_v17 }
 0x7ed   :  { %1200 = vmatpush1.bf16.msra.mxu0 %v2113_v19 }
 0x7ee   :  { %1201 = vmatprep.subr.bf16.mxu0 %v2118_v20 }
 0x7f1   :  { %1202 = vmatpush1.bf16.msra.mxu0 %v2129_v22 }
 0x844   :  { %v1003_v29 = vpop.permute.xlu1 %1002 }
 0x851   :  { %v1019_v49 = vpop.permute.xlu1 %1018 }
 0x8a4   :  { %v977_v43 = vpop.f32.mrf.mxu0 }
 0x8a5   :  { %v984_v60 = vadd.f32 %v977_v43, %v2187_v5 }
 0x8a6   :  { %v979_v36 = vpop.f32.mrf.mxu0 }
 0x8a7   :  { %v1775_v61 = vmul.f32 -1.442695, %v984_v60  ;;  %v985_v62 = vadd.f32 %v979_v36, %v2191_v10  ;;  %v1779_v10 = vld [vmem:[%s2511_s3 + $0x18] sm:$0xff] }
 0x8a8   :  { %v981_v0 = vpop.f32.mrf.mxu0 }
 0x8a9   :  { %v1776_v39 = vmul.f32 -1.442695, %v985_v62  ;;  %1951 = vpow2.f32 %v1775_v61  ;;  %v1899_v61 = vld [vmem:[%s2513_s7 + $0x8] sm:$0xff]  }
 0x8aa   :  { %v982_v3 = vpop.f32.mrf.mxu0  ;;  %1845 = vmatprep.subr.bf16.mxu0 %v1899_v61 }
 0x8ab   :  { %1953 = vpow2.f32 %v1776_v39 }
 0x8b6   :  { %v1952_v6 = vpop.eup %1951 }
 0x8b7   :  { %v992_v11 = vadd.f32 1.0, %v1952_v6 }
 0x8b8   :  { %v1954_v7 = vpop.eup %1953 }
 0x8b9   :  { %v993_v8 = vadd.f32 1.0, %v1954_v7 }
 0x8bb   :  { %1955 = vrcp.f32 %v993_v8 }
 0x8bc   :  { %1957 = vrcp.f32 %v992_v11  ;;  %v1792_v11 = vld [vmem:[%s2510_s2 + $0x30] sm:$0xff] }
 0x8c8   :  { %v1956_v16 = vpop.eup %1955 }
 0x8c9   :  { %v998_v18 = vmul.f32 2.0, %v1956_v16  ;;  %v1958_v26 = vpop.eup %1957 }
 0x8ca   :  { %v1005_v30 = vmul.f32 %v1958_v26, %v1003_v29  ;;  %v1900_v29 = vld [vmem:[#allocation4] sm:$0xff]  }
 0x8cb   :  { %v1777_v25 = vadd.f32 -1.0, %v998_v18 }
 0x8cd   :  { %v1006_v5 = vmul.f32 %v1958_v26, %v1777_v25 }
 0x8cf   :  { %1008 = vrot.lane.b32.xlu0 %v1006_v5, %s1993_s4 }
 0x8d3   :  { %1025 = vperm.xlu0 %1874, %v1779_v10   ;;  %v1901_v10 = vld [vmem:[%s2513_s7] sm:$0xff]  }
 0x941   :  { %v1009_v31 = vpop.permute.xlu0 %1008 }
 0x942   :  { %v1011_v37 = vadd.f32 %v1009_v31, %v1005_v30  ;;  %v1902_v30 = vld [vmem:[#allocation4 + $0x8] sm:$0xff]  }
 0x944   :  { %1959 = vtanh.f32 %v1011_v37  ;;  %1030 = vrot.lane.b32.xlu0 %v1011_v37, %s1993_s4 }
 0x94e   :  { %v1026_v12 = vpop.permute.xlu0 %1025 }
 0x94f   :  { %v1028_v50 = vsel %vm539_vm3, %v1019_v49, %v1026_v12 }
 0x951   :  { %v1960_v41 = vpop.eup %1959 }
 0x952   :  { %v1013_v45 = vmul.f32 %v1960_v41, %v1956_v16 }
 0x954   :  { %1036 = vrot.lane.b32.xlu1 %v1013_v45, %s1993_s4 }
 0x9b6   :  { %v1031_v63 = vpop.permute.xlu0 %1030 }
 0x9b7   :  { %v1033_v4 = vmul.f32 %v1031_v63, %v1028_v50 }
 0x9b9   :  { %1034 = vst.msk [vmem:[#allocation7] sm:$0xff] %vm94_vm0, %v1033_v4 }
 0x9c0   :  { %v1122_v51 = vld [vmem:[#allocation7] sm:$0xff] }
 0x9c1   :  { %1124 = vrot.lane.b32.xlu1 %v1122_v51, %s1993_s4 }
 0x9c5   :  { %1140 = vperm.xlu1 %1873, %v1785_v44  }
 0x9c6   :  { %v1037_v53 = vpop.permute.xlu1 %1036 }
 0x9c7   :  { %v1039_v54 = vmul.f32 %v1037_v53, %v1028_v50 }
 0x9c9   :  { %1040 = vst.msk [vmem:[#allocation6] sm:$0xff] %vm94_vm0, %v1039_v54  ;;  %v2338_v55 = vpack.c.bf16 %v1039_v54, %v1039_v54 }
 0x9cb   :  { %1043 = vst.msk [vmem:[#allocation4 + $0x10] sm:$0xf] %vm554_vm4, %v2338_v55 }
 0x9d0   :  { %v1060_v47 = vld [vmem:[#allocation6] sm:$0xff] }
 0x9d1   :  { %v1061_v56 = vpack.c.bf16 %v1060_v47, %v1060_v47 }
 0x9d3   :  { %1781 = vmatmul.mubr.msk.bf16.vlgmr.msra.gmra.mxu1 %vm94_vm0, %v1061_v56 }
 0x9d4   :  { %1317 = vmatpush1.bf16.msra.mxu1 %v2075_v13  ;;  %1340 = vmatprep.mubr.bf16.mxu1 %v1991_v2 }
 0x9d5   :  { %1318 = vmatprep.subr.bf16.mxu1 %v2082_v14 }
 0x9d8   :  { %1319 = vmatpush1.bf16.msra.mxu1 %v2091_v15 }
 0x9d9   :  { %1320 = vmatprep.subr.bf16.mxu1 %v2101_v17 }
 0x9dc   :  { %1321 = vmatpush1.bf16.msra.mxu1 %v2113_v19 }
 0x9dd   :  { %1322 = vmatprep.subr.bf16.mxu1 %v2118_v20 }
 0x9e0   :  { %1323 = vmatpush1.bf16.msra.mxu1 %v2129_v22 }
 0xa33   :  { %v1125_v27 = vpop.permute.xlu1 %1124 }
 0xa40   :  { %v1141_v39 = vpop.permute.xlu1 %1140 }
 0xa93   :  { %v1099_v57 = vpop.f32.mrf.mxu1 }
 0xa94   :  { %v1106_v9 = vadd.f32 %v1099_v57, %v2195_v23 }
 0xa95   :  { %v1101_v21 = vpop.f32.mrf.mxu1 }
 0xa96   :  { %v1782_v35 = vmul.f32 -1.442695, %v1106_v9  ;;  %v1107_v13 = vadd.f32 %v1101_v21, %v2199_v28  ;;  %v1786_v28 = vld [vmem:[%s2511_s3 + $0x10] sm:$0xff] }
 0xa97   :  { %v1103_v2 = vpop.f32.mrf.mxu1 }
 0xa98   :  { %v1783_v40 = vmul.f32 -1.442695, %v1107_v13  ;;  %1961 = vpow2.f32 %v1782_v35  ;;  %v1793_v2 = vld [vmem:[%s2511_s3 + $0x8] sm:$0xff] }
 0xa99   :  { %v1104_v14 = vpop.f32.mrf.mxu1 }
 0xa9a   :  { %1963 = vpow2.f32 %v1783_v40 }
 0xaa5   :  { %v1962_v15 = vpop.eup %1961 }
 0xaa6   :  { %v1114_v19 = vadd.f32 1.0, %v1962_v15 }
 0xaa7   :  { %v1964_v17 = vpop.eup %1963 }
 0xaa8   :  { %v1115_v46 = vadd.f32 1.0, %v1964_v17 }
 0xaaa   :  { %1965 = vrcp.f32 %v1115_v46 }
 0xaab   :  { %1967 = vrcp.f32 %v1114_v19 }
 0xab7   :  { %v1966_v20 = vpop.eup %1965 }
 0xab8   :  { %v1120_v22 = vmul.f32 2.0, %v1966_v20  ;;  %v1968_v38 = vpop.eup %1967 }
 0xab9   :  { %v1127_v32 = vmul.f32 %v1968_v38, %v1125_v27  ;;  %v1799_v27 = vld [vmem:[%s2510_s2 + $0x38] sm:$0xff] }
 0xaba   :  { %v1784_v58 = vadd.f32 -1.0, %v1120_v22 }
 0xabc   :  { %v1128_v23 = vmul.f32 %v1968_v38, %v1784_v58 }
 0xabe   :  { %1130 = vrot.lane.b32.xlu0 %v1128_v23, %s1993_s4 }
 0xac2   :  { %1147 = vperm.xlu0 %1874, %v1786_v28  }
 0xb30   :  { %v1131_v43 = vpop.permute.xlu0 %1130 }
 0xb31   :  { %v1133_v60 = vadd.f32 %v1131_v43, %v1127_v32 }
 0xb33   :  { %1969 = vtanh.f32 %v1133_v60  ;;  %1152 = vrot.lane.b32.xlu0 %v1133_v60, %s1993_s4 }
 0xb3d   :  { %v1148_v0 = vpop.permute.xlu0 %1147 }
 0xb3e   :  { %v1150_v3 = vsel %vm539_vm3, %v1141_v39, %v1148_v0 }
 0xb40   :  { %v1970_v36 = vpop.eup %1969 }
 0xb41   :  { %v1135_v62 = vmul.f32 %v1970_v36, %v1966_v20 }
 0xb43   :  { %1158 = vrot.lane.b32.xlu1 %v1135_v62, %s1993_s4 }
 0xba5   :  { %v1153_v6 = vpop.permute.xlu0 %1152 }
 0xba6   :  { %v1155_v7 = vmul.f32 %v1153_v6, %v1150_v3 }
 0xba8   :  { %1156 = vst.msk [vmem:[#allocation7] sm:$0xff] %vm94_vm0, %v1155_v7 }
 0xbaf   :  { %v1244_v8 = vld [vmem:[#allocation7] sm:$0xff] }
 0xbb0   :  { %1246 = vrot.lane.b32.xlu1 %v1244_v8, %s1993_s4 }
 0xbb4   :  { %1262 = vperm.xlu1 %1873, %v1792_v11  }
 0xbb5   :  { %v1159_v16 = vpop.permute.xlu1 %1158 }
 0xbb6   :  { %v1161_v18 = vmul.f32 %v1159_v16, %v1150_v3 }
 0xbb8   :  { %1162 = vst.msk [vmem:[#allocation6] sm:$0xff] %vm94_vm0, %v1161_v18  ;;  %v2369_v25 = vpack.c.bf16 %v1161_v18, %v1161_v18 }
 0xbba   :  { %1165 = vst.msk [vmem:[#allocation4 + $0x14] sm:$0xf] %vm554_vm4, %v2369_v25 }
 0xbbf   :  { %v1182_v26 = vld [vmem:[#allocation6] sm:$0xff] }
 0xbc0   :  { %v1183_v5 = vpack.c.bf16 %v1182_v26, %v1182_v26 }
 0xbc1   :  { %v1903_v31 = vld [vmem:[#allocation4 + $0x10] sm:$0xff]  }
 0xbc2   :  { %1788 = vmatmul.mubr.msk.bf16.vlgmr.msra.gmra.mxu0 %vm94_vm0, %v1183_v5 }
 0xbc3   :  { %1846 = vmatpush3.bf16.msra.mxu0 %v1899_v61  ;;  %1849 = vmatprep.mubr.msk.bf16.mxu0 %vm539_vm3, %v1900_v29 }
 0xbc4   :  { %1847 = vmatprep.subr.bf16.mxu0 %v1901_v10 }
 0xbc7   :  { %1848 = vmatpush3.bf16.msra.mxu0 %v1901_v10 }
 0xbca   :  { %1850 = vmatmul.mubr.msk.bf16.vlgmr.msra.gmra.mxu0 %vm539_vm3, %v1902_v30 }
 0xbcb   :  { %1853 = vmatprep.mubr.msk.bf16.mxu0 %vm539_vm3, %v1903_v31 }
 0xc22   :  { %v1247_v40 = vpop.permute.xlu1 %1246 }
 0xc2f   :  { %v1263_v22 = vpop.permute.xlu1 %1262 }
 0xc82   :  { %v1221_v37 = vpop.f32.mrf.mxu0 }
 0xc83   :  { %v1228_v41 = vadd.f32 %v1221_v37, %v2203_v33 }
 0xc84   :  { %v1223_v45 = vpop.f32.mrf.mxu0 }
 0xc85   :  { %v1789_v12 = vmul.f32 -1.442695, %v1228_v41  ;;  %v1229_v49 = vadd.f32 %v1223_v45, %v2205_v48 }
 0xc86   :  { %v1225_v50 = vpop.f32.mrf.mxu0 }
 0xc87   :  { %v1790_v63 = vmul.f32 -1.442695, %v1229_v49  ;;  %1971 = vpow2.f32 %v1789_v12 }
 0xc88   :  { %v1226_v4 = vpop.f32.mrf.mxu0 }
 0xc89   :  { %1973 = vpow2.f32 %v1790_v63 }
 0xc8a   :  { %v1851_v51 = vpop.f32.mrf.mxu0 }
 0xc8b   :  { %1660 = vst.msk [vmem:[%s2514_s8 + $0x10] sm:$0xff] %vm151_vm2, %v1851_v51 }
 0xc8c   :  { %v1505_v44 = vpop.f32.mrf.mxu0 }
 0xc8d   :  { %1658 = vst.msk [vmem:[%s2514_s8] sm:$0xff] %vm151_vm2, %v1505_v44 }
 0xc8e   :  { %v1852_v33 = vpop.f32.mrf.mxu0 }
 0xc8f   :  { %1661 = vst.msk [vmem:[%s2514_s8 + $0x18] sm:$0xff] %vm151_vm2, %v1852_v33 }
 0xc90   :  { %v1508_v48 = vpop.f32.mrf.mxu0 }
 0xc91   :  { %1659 = vst.msk [vmem:[%s2514_s8 + $0x8] sm:$0xff] %vm151_vm2, %v1508_v48 }
 0xc94   :  { %v1972_v53 = vpop.eup %1971 }
 0xc95   :  { %v1236_v56 = vadd.f32 1.0, %v1972_v53  ;;  %v1905_v53 = vld [vmem:[%s2513_s7 + $0x18] sm:$0xff]  }
 0xc96   :  { %v1974_v54 = vpop.eup %1973  ;;  %1857 = vmatprep.subr.bf16.mxu1 %v1905_v53 }
 0xc97   :  { %v1237_v47 = vadd.f32 1.0, %v1974_v54  ;;  %v1906_v54 = vld [vmem:[%s2513_s7 + $0x10] sm:$0xff]  }
 0xc99   :  { %1975 = vrcp.f32 %v1237_v47 }
 0xc9a   :  { %1977 = vrcp.f32 %v1236_v56 }
 0xca6   :  { %v1976_v57 = vpop.eup %1975 }
 0xca7   :  { %v1242_v9 = vmul.f32 2.0, %v1976_v57  ;;  %v1978_v35 = vpop.eup %1977 }
 0xca8   :  { %v1249_v14 = vmul.f32 %v1978_v35, %v1247_v40 }
 0xca9   :  { %v1791_v21 = vadd.f32 -1.0, %v1242_v9 }
 0xcab   :  { %v1250_v13 = vmul.f32 %v1978_v35, %v1791_v21 }
 0xcad   :  { %1252 = vrot.lane.b32.xlu0 %v1250_v13, %s1993_s4 }
 0xcb1   :  { %1269 = vperm.xlu0 %1874, %v1793_v2  }
 0xd1f   :  { %v1253_v15 = vpop.permute.xlu0 %1252 }
 0xd20   :  { %v1255_v17 = vadd.f32 %v1253_v15, %v1249_v14 }
 0xd22   :  { %1979 = vtanh.f32 %v1255_v17  ;;  %1274 = vrot.lane.b32.xlu0 %v1255_v17, %s1993_s4 }
 0xd2c   :  { %v1270_v20 = vpop.permute.xlu0 %1269 }
 0xd2d   :  { %v1272_v58 = vsel %vm539_vm3, %v1263_v22, %v1270_v20 }
 0xd2f   :  { %v1980_v46 = vpop.eup %1979 }
 0xd30   :  { %v1257_v19 = vmul.f32 %v1980_v46, %v1976_v57 }
 0xd32   :  { %1280 = vrot.lane.b32.xlu1 %v1257_v19, %s1993_s4 }
 0xd94   :  { %v1275_v38 = vpop.permute.xlu0 %1274 }
 0xd95   :  { %v1277_v23 = vmul.f32 %v1275_v38, %v1272_v58 }
 0xd97   :  { %1278 = vst.msk [vmem:[#allocation7] sm:$0xff] %vm94_vm0, %v1277_v23 }
 0xd9e   :  { %v1365_v28 = vld [vmem:[#allocation7] sm:$0xff] }
 0xd9f   :  { %1367 = vrot.lane.b32.xlu1 %v1365_v28, %s1993_s4 }
 0xda3   :  { %1383 = vperm.xlu1 %1873, %v1799_v27  }
 0xda4   :  { %v1281_v32 = vpop.permute.xlu1 %1280 }
 0xda5   :  { %v1283_v43 = vmul.f32 %v1281_v32, %v1272_v58 }
 0xda7   :  { %1284 = vst.msk [vmem:[#allocation6] sm:$0xff] %vm94_vm0, %v1283_v43  ;;  %v1285_v60 = vpack.c.bf16 %v1283_v43, %v1283_v43 }
 0xda9   :  { %1287 = vst.msk [vmem:[#allocation4 + $0x18] sm:$0xf] %vm554_vm4, %v1285_v60 }
 0xdae   :  { %v1303_v36 = vld [vmem:[#allocation6] sm:$0xff] }
 0xdaf   :  { %v1304_v61 = vpack.c.bf16 %v1303_v36, %v1303_v36 }
 0xdb1   :  { %1795 = vmatmul.mubr.msk.bf16.vlgmr.msra.gmra.mxu1 %vm94_vm0, %v1304_v61 }
 0xdb2   :  { %1858 = vmatpush3.bf16.msra.mxu1 %v1905_v53 }
 0xdb3   :  { %1859 = vmatprep.subr.bf16.mxu1 %v1906_v54 }
 0xdb6   :  { %1860 = vmatpush3.bf16.msra.mxu1 %v1906_v54 }
 0xe11   :  { %v1368_v37 = vpop.permute.xlu1 %1367 }
 0xe1e   :  { %v1384_v51 = vpop.permute.xlu1 %1383 }
 0xe71   :  { %v1342_v62 = vpop.f32.mrf.mxu1 }
 0xe72   :  { %v1349_v0 = vadd.f32 %v1342_v62, %v2208_v52 }
 0xe73   :  { %v1344_v39 = vpop.f32.mrf.mxu1 }
 0xe74   :  { %v1796_v3 = vmul.f32 -1.442695, %v1349_v0  ;;  %v1350_v6 = vadd.f32 %v1344_v39, %v2211_v42  ;;  %v1386_v42 = vld [vmem:[%s2511_s3] sm:$0xff] }
 0xe75   :  { %v1346_v7 = vpop.f32.mrf.mxu1 }
 0xe76   :  { %v1797_v8 = vmul.f32 -1.442695, %v1350_v6  ;;  %1981 = vpow2.f32 %v1796_v3 }
 0xe77   :  { %v1347_v11 = vpop.f32.mrf.mxu1 }
 0xe78   :  { %1983 = vpow2.f32 %v1797_v8 }
 0xe83   :  { %v1982_v16 = vpop.eup %1981 }
 0xe84   :  { %v1357_v5 = vadd.f32 1.0, %v1982_v16 }
 0xe85   :  { %v1984_v18 = vpop.eup %1983 }
 0xe86   :  { %v1358_v26 = vadd.f32 1.0, %v1984_v18 }
 0xe88   :  { %1985 = vrcp.f32 %v1358_v26 }
 0xe89   :  { %1987 = vrcp.f32 %v1357_v5 }
 0xe95   :  { %v1986_v10 = vpop.eup %1985 }
 0xe96   :  { %v1363_v29 = vmul.f32 2.0, %v1986_v10  ;;  %v1988_v31 = vpop.eup %1987 }
 0xe97   :  { %v1370_v41 = vmul.f32 %v1988_v31, %v1368_v37 }
 0xe98   :  { %v1798_v30 = vadd.f32 -1.0, %v1363_v29 }
 0xe9a   :  { %v1371_v52 = vmul.f32 %v1988_v31, %v1798_v30 }
 0xe9c   :  { %1373 = vrot.lane.b32.xlu0 %v1371_v52, %s1993_s4 }
 0xea0   :  { %1389 = vperm.xlu0 %1874, %v1386_v42  }
 0xea4   :  { %1291 = vrot.lane.b32.xlu0 %v1285_v60, %s1994_s18 }
 0xea8   :  { %1047 = vrot.lane.b32.xlu0 %v2338_v55, %s1994_s18 }
 0xeac   :  { %803 = vrot.lane.b32.xlu0 %v2281_v1, %s1994_s18 }
 0xeb0   :  { %559 = vrot.lane.b32.xlu0 %v2220_v34, %s1994_s18 }
 0xf0e   :  { %v1374_v45 = vpop.permute.xlu0 %1373 }
 0xf0f   :  { %v1376_v12 = vadd.f32 %v1374_v45, %v1370_v41 }
 0xf11   :  { %1989 = vtanh.f32 %v1376_v12  ;;  %1394 = vrot.lane.b32.xlu0 %v1376_v12, %s1993_s4 }
 0xf1b   :  { %v1390_v49 = vpop.permute.xlu0 %1389 }
 0xf1c   :  { %v1392_v44 = vsel %vm539_vm3, %v1384_v51, %v1390_v49 }
 0xf1e   :  { %v1990_v50 = vpop.eup %1989 }
 0xf1f   :  { %v1292_v63 = vpop.permute.xlu0 %1291  ;;  %v1378_v4 = vmul.f32 %v1990_v50, %v1986_v10 }
 0xf20   :  { %1295 = vst.msk [vmem:[#allocation5 + $0x4] sm:$0xf] %vm554_vm4, %v1292_v63 }
 0xf21   :  { %1400 = vrot.lane.b32.xlu1 %v1378_v4, %s1993_s4 }
 0xf23   :  { %v1048_v55 = vpop.permute.xlu0 %1047 }
 0xf24   :  { %1051 = vst.msk [vmem:[#allocation5 + $0xc] sm:$0xf] %vm554_vm4, %v1048_v55 }
 0xf27   :  { %v804_v1 = vpop.permute.xlu0 %803 }
 0xf28   :  { %807 = vst.msk [vmem:[#allocation5 + $0x14] sm:$0xf] %vm554_vm4, %v804_v1 }
 0xf2b   :  { %v560_v34 = vpop.permute.xlu0 %559 }
 0xf2c   :  { %563 = vst.msk [vmem:[#allocation5 + $0x1c] sm:$0xf] %vm554_vm4, %v560_v34 }
 0xf83   :  { %v1395_v33 = vpop.permute.xlu0 %1394 }
 0xf84   :  { %v1397_v48 = vmul.f32 %v1395_v33, %v1392_v44 }
 0xf86   :  { %1398 = vst.msk [vmem:[#allocation7] sm:$0xff] %vm94_vm0, %v1397_v48 }
 0xf93   :  { %v1401_v47 = vpop.permute.xlu1 %1400 }
 0xf94   :  { %v1403_v56 = vmul.f32 %v1401_v47, %v1392_v44 }
 0xf96   :  { %1404 = vst.msk [vmem:[#allocation6] sm:$0xff] %vm94_vm0, %v1403_v56  ;;  %v1405_v57 = vpack.c.bf16 %v1403_v56, %v1403_v56 }
 0xf98   :  { %1407 = vst.msk [vmem:[#allocation4 + $0x1c] sm:$0xf] %vm554_vm4, %v1405_v57  ;;  %1411 = vrot.lane.b32.xlu1 %v1405_v57, %s1994_s18 }
 0xf9c   :  { %1169 = vrot.lane.b32.xlu1 %v2369_v25, %s1994_s18 }
 0xf9f   :  { %v1904_v9 = vld [vmem:[#allocation4 + $0x18] sm:$0xff]  }
 0xfa0   :  { %925 = vrot.lane.b32.xlu1 %v2310_v59, %s1994_s18  ;;  %1854 = vmatmul.mubr.msk.bf16.gmra.mxu0 %vm539_vm3, %v1904_v9 }
 0xfa4   :  { %681 = vrot.lane.b32.xlu1 %v2252_v24, %s1994_s18 }
0x100a   :  { %v1412_v21 = vpop.permute.xlu1 %1411 }
0x100b   :  { %1414 = vst.msk [vmem:[#allocation5] sm:$0xf] %vm554_vm4, %v1412_v21 }
0x100e   :  { %v1170_v35 = vpop.permute.xlu1 %1169 }
0x100f   :  { %1173 = vst.msk [vmem:[#allocation5 + $0x8] sm:$0xf] %vm554_vm4, %v1170_v35 }
0x1012   :  { %v926_v13 = vpop.permute.xlu1 %925  ;;  %v1907_v2 = vld [vmem:[#allocation5] sm:$0xff]  }
0x1013   :  { %929 = vst.msk [vmem:[#allocation5 + $0x10] sm:$0xf] %vm554_vm4, %v926_v13  ;;  %1861 = vmatprep.mubr.msk.bf16.mxu1 %vm539_vm3, %v1907_v2 }
0x1016   :  { %v682_v25 = vpop.permute.xlu1 %681  ;;  %v1908_v40 = vld [vmem:[#allocation5 + $0x8] sm:$0xff]  }
0x1017   :  { %685 = vst.msk [vmem:[#allocation5 + $0x18] sm:$0xf] %vm554_vm4, %v682_v25  ;;  %1862 = vmatmul.mubr.msk.bf16.vlgmr.msra.gmra.mxu1 %vm539_vm3, %v1908_v40 }
0x101a   :  { %v1909_v59 = vld [vmem:[#allocation5 + $0x10] sm:$0xff]  }
0x101b   :  { %1865 = vmatprep.mubr.msk.bf16.mxu1 %vm539_vm3, %v1909_v59 }
0x101e   :  { %v1910_v24 = vld [vmem:[#allocation5 + $0x18] sm:$0xff]  }
0x101f   :  { %1866 = vmatmul.mubr.msk.bf16.gmra.mxu1 %vm539_vm3, %v1910_v24 }
0x1060   :  { %v1855_v14 = vpop.f32.mrf.mxu0 }
0x1061   :  { %1664 = vst.msk [vmem:[%s2514_s8 + $0x30] sm:$0xff] %vm151_vm2, %v1855_v14 }
0x1062   :  { %v1521_v15 = vpop.f32.mrf.mxu0 }
0x1063   :  { %1662 = vst.msk [vmem:[%s2514_s8 + $0x20] sm:$0xff] %vm151_vm2, %v1521_v15 }
0x1064   :  { %v1856_v17 = vpop.f32.mrf.mxu0 }
0x1065   :  { %1665 = vst.msk [vmem:[%s2514_s8 + $0x38] sm:$0xff] %vm151_vm2, %v1856_v17 }
0x1066   :  { %v1524_v46 = vpop.f32.mrf.mxu0 }
0x1067   :  { %1663 = vst.msk [vmem:[%s2514_s8 + $0x28] sm:$0xff] %vm151_vm2, %v1524_v46 }
0x10d7   :  { %v1863_v19 = vpop.f32.mrf.mxu1 }
0x10d8   :  { %1668 = vst.msk [vmem:[%s2515_s9 + $0x10] sm:$0xff] %vm151_vm2, %v1863_v19 }
0x10d9   :  { %v1627_v20 = vpop.f32.mrf.mxu1 }
0x10da   :  { %1666 = vst.msk [vmem:[%s2515_s9] sm:$0xff] %vm151_vm2, %v1627_v20 }
0x10db   :  { %v1864_v22 = vpop.f32.mrf.mxu1 }
0x10dc   :  { %1669 = vst.msk [vmem:[%s2515_s9 + $0x18] sm:$0xff] %vm151_vm2, %v1864_v22 }
0x10dd   :  { %v1630_v58 = vpop.f32.mrf.mxu1 }
0x10de   :  { %1667 = vst.msk [vmem:[%s2515_s9 + $0x8] sm:$0xff] %vm151_vm2, %v1630_v58 }
0x10df   :  { %v1867_v38 = vpop.f32.mrf.mxu1 }
0x10e0   :  { %1672 = vst.msk [vmem:[%s2515_s9 + $0x30] sm:$0xff] %vm151_vm2, %v1867_v38 }
0x10e1   :  { %v1643_v23 = vpop.f32.mrf.mxu1 }
0x10e2   :  { %1670 = vst.msk [vmem:[%s2515_s9 + $0x20] sm:$0xff] %vm151_vm2, %v1643_v23 }
0x10e3   :  { %v1868_v28 = vpop.f32.mrf.mxu1 }
0x10e4   :  { %1673 = vst.msk [vmem:[%s2515_s9 + $0x38] sm:$0xff] %vm151_vm2, %v1868_v28 }
0x10e5   :  { %v1646_v27 = vpop.f32.mrf.mxu1 }
0x10e6   :  { %1671 = vst.msk [vmem:[%s2515_s9 + $0x28] sm:$0xff] %vm151_vm2, %v1646_v27 }

</bundles_post_ra>
